<compile_context>
chip_gen: v6e
topology: v6e:2x2x1
jax: 0.10.0
libtpu: 0.0.40
codegen_flags: <defaults>
</compile_context>

<pallas_src>
import jax
import jax.numpy as jnp
from jax.experimental import pallas as pl
from jax.experimental.pallas import tpu as pltpu


def _softplus(x):
    # Matches torch.nn.Softplus (beta=1, threshold=20); log1p for precision.
    return jnp.where(x > 20.0, x, jnp.log1p(jnp.exp(jnp.minimum(x, 20.0))))


def _make_flow_kernel(num_flows, input_dim, hidden_dim):
    D = input_dim
    H2 = 2 * hidden_dim

    def kernel(x_ref, c_ref, w1x_ref, w1c_ref, b1_ref,
               w2_ref, b2_ref, w3_ref, b3_ref,
               z_ref, ld_ref):
        x = x_ref[...]                                    # [B, D] running flow variable
        c = c_ref[...]                                    # [B, C]

        # Flow-independent condition projection for ALL flows at once, with the
        # fused first-layer bias folded in: [B, num_flows * 2H].
        cp = jnp.dot(c, w1c_ref[...],
                     preferred_element_type=jnp.float32) + b1_ref[...]

        ld = jnp.zeros((x.shape[0], 1), jnp.float32)

        # num_flows is tiny; a static unrolled loop keeps every weight index and
        # lane slice a compile-time constant (single basic block for the LLO
        # scheduler, no per-step grid overhead).
        for i in range(num_flows):
            h = jnp.dot(x, w1x_ref[i], preferred_element_type=jnp.float32)
            h = h + cp[:, i * H2:(i + 1) * H2]
            h = jnp.maximum(h, 0.0)
            h = jnp.dot(h, w2_ref[i],
                        preferred_element_type=jnp.float32) + b2_ref[i]
            h = jnp.maximum(h, 0.0)
            out = jnp.dot(h, w3_ref[i],
                          preferred_element_type=jnp.float32) + b3_ref[i]

            mu = out[:, :D]
            sigma = _softplus(out[:, D:]) + 1e-5
            inv_sigma = pl.reciprocal(sigma, approx=False)
            x = (x - mu) * inv_sigma
            ld = ld - jnp.sum(jnp.log(sigma), axis=1, keepdims=True)

        z_ref[...] = x
        ld_ref[...] = ld

    return kernel


def pack_params(params):
    """Fuse mu/sigma MLPs per layer and lay out the hoisted condition weights."""
    NF, D, H = params["mu_w1x"].shape
    C = params["mu_w1c"].shape[1]
    zHH = jnp.zeros((NF, H, H), jnp.float32)
    zHD = jnp.zeros((NF, H, D), jnp.float32)

    w1x = jnp.concatenate([params["mu_w1x"], params["sg_w1x"]], axis=2)     # (NF, D, 2H)

    w1c = jnp.concatenate([params["mu_w1c"], params["sg_w1c"]], axis=2)     # (NF, C, 2H)
    w1c = jnp.transpose(w1c, (1, 0, 2)).reshape(C, NF * 2 * H)              # (C, NF*2H)
    b1 = jnp.concatenate([params["mu_b1"], params["sg_b1"]], axis=2)        # (NF, 1, 2H)
    b1 = b1.reshape(1, NF * 2 * H)                                          # (1, NF*2H)

    w2 = jnp.concatenate(
        [jnp.concatenate([params["mu_w2"], zHH], axis=2),
         jnp.concatenate([zHH, params["sg_w2"]], axis=2)], axis=1)          # (NF, 2H, 2H)
    b2 = jnp.concatenate([params["mu_b2"], params["sg_b2"]], axis=2)        # (NF, 1, 2H)

    w3 = jnp.concatenate(
        [jnp.concatenate([params["mu_w3"], zHD], axis=2),
         jnp.concatenate([zHD, params["sg_w3"]], axis=2)], axis=1)          # (NF, 2H, 2D)
    b3 = jnp.concatenate([params["mu_b3"], params["sg_b3"]], axis=2)        # (NF, 1, 2D)

    return {"w1x": w1x, "w1c": w1c, "b1": b1, "w2": w2, "b2": b2,
            "w3": w3, "b3": b3}


def conditional_normalizing_flow(x, condition, packed, num_flows, hidden_dim):
    """Forward pass (reverse=False). Returns (z, log_det_sum)."""
    B, D = x.shape

    def full_spec(arr):
        if arr.ndim == 2:
            return pl.BlockSpec(arr.shape, lambda i: (0, 0))
        return pl.BlockSpec(arr.shape, lambda i: (0, 0, 0))

    args = (x, condition, packed["w1x"], packed["w1c"], packed["b1"],
            packed["w2"], packed["b2"], packed["w3"], packed["b3"])
    in_specs = [full_spec(a) for a in args]

    out_shapes = (jax.ShapeDtypeStruct((B, D), jnp.float32),
                  jax.ShapeDtypeStruct((B, 1), jnp.float32))
    out_specs = (pl.BlockSpec((B, D), lambda i: (0, 0)),
                 pl.BlockSpec((B, 1), lambda i: (0, 0)))

    kernel = _make_flow_kernel(num_flows, D, hidden_dim)

    z, log_det = pl.pallas_call(
        kernel,
        out_shape=out_shapes,
        grid_spec=pltpu.PrefetchScalarGridSpec(
            num_scalar_prefetch=0,
            grid=(1,),
            in_specs=in_specs,
            out_specs=out_specs),
        compiler_params=pltpu.CompilerParams(
            dimension_semantics=("arbitrary",)),
    )(*args)

    return z, log_det[:, 0]


def init_params(key, input_dim, hidden_dim, cond_dim, num_flows):
    """Deterministic synthetic parameters, stacked over flows."""
    shapes = {
        "mu_w1x": (num_flows, input_dim, hidden_dim),
        "mu_w1c": (num_flows, cond_dim, hidden_dim),
        "mu_b1":  (num_flows, 1, hidden_dim),
        "mu_w2":  (num_flows, hidden_dim, hidden_dim),
        "mu_b2":  (num_flows, 1, hidden_dim),
        "mu_w3":  (num_flows, hidden_dim, input_dim),
        "mu_b3":  (num_flows, 1, input_dim),
        "sg_w1x": (num_flows, input_dim, hidden_dim),
        "sg_w1c": (num_flows, cond_dim, hidden_dim),
        "sg_b1":  (num_flows, 1, hidden_dim),
        "sg_w2":  (num_flows, hidden_dim, hidden_dim),
        "sg_b2":  (num_flows, 1, hidden_dim),
        "sg_w3":  (num_flows, hidden_dim, input_dim),
        "sg_b3":  (num_flows, 1, input_dim),
    }
    params = {}
    keys = jax.random.split(key, len(shapes))
    for k, (name, shp) in zip(keys, shapes.items()):
        fan_in = shp[1] if shp[1] > 1 else shp[2]
        bound = 1.0 / jnp.sqrt(jnp.float32(fan_in))
        params[name] = jax.random.uniform(
            k, shp, jnp.float32, minval=-bound, maxval=bound)
    return params


def reference_forward(x, condition, params, num_flows):
    """Pure-JAX reference matching the PyTorch module (reverse=False)."""
    log_det_sum = jnp.zeros((x.shape[0],), jnp.float32)
    for i in range(num_flows):
        def mlp(p):
            h = x @ params[p + "_w1x"][i] + condition @ params[p + "_w1c"][i] \
                + params[p + "_b1"][i]
            h = jnp.maximum(h, 0.0)
            h = jnp.maximum(h @ params[p + "_w2"][i] + params[p + "_b2"][i], 0.0)
            return h @ params[p + "_w3"][i] + params[p + "_b3"][i]
        mu = mlp("mu")
        sigma = jax.nn.softplus(mlp("sg")) + 1e-5
        z = (x - mu) / sigma
        log_det_sum = log_det_sum + (-jnp.sum(jnp.log(sigma), axis=1))
        x = z
    return x, log_det_sum


if __name__ == "__main__":
    input_dim, hidden_dim, cond_dim, num_flows = 8, 32, 8, 5
    batch = 8

    key = jax.random.PRNGKey(0)
    kx, kc, kp = jax.random.split(key, 3)
    x = jax.random.normal(kx, (batch, input_dim), jnp.float32)
    cond = jax.random.normal(kc, (batch, cond_dim), jnp.float32)
    params = init_params(kp, input_dim, hidden_dim, cond_dim, num_flows)

    packed = pack_params(params)   # one-time weight repack (outside the kernel)

    z, log_det = conditional_normalizing_flow(x, cond, packed, num_flows,
                                              hidden_dim)
    z = jax.block_until_ready(z)
    log_det = jax.block_until_ready(log_det)

    z_ref, ld_ref = reference_forward(x, cond, params, num_flows)
    assert z.shape == (batch, input_dim) and log_det.shape == (batch,)
    assert jnp.allclose(z, z_ref, atol=2e-4, rtol=2e-4), "z mismatch"
    assert jnp.allclose(log_det, ld_ref, atol=2e-4, rtol=2e-4), "log_det mismatch"

    # TODO(synk): reverse=True generative path not implemented (forward default is reverse=False).
    print("KERNEL_OK")
</pallas_src>

<mosaic_0001>
module attributes {stable_mosaic.version = 11 : i64} {
  func.func @kernel(%arg0: i32, %arg1: memref<8x8xf32, #tpu.memory_space<vmem>>, %arg2: memref<8x8xf32, #tpu.memory_space<vmem>>, %arg3: memref<5x8x64xf32, #tpu.memory_space<vmem>>, %arg4: memref<8x320xf32, #tpu.memory_space<vmem>>, %arg5: memref<1x320xf32, #tpu.memory_space<vmem>>, %arg6: memref<5x64x64xf32, #tpu.memory_space<vmem>>, %arg7: memref<5x1x64xf32, #tpu.memory_space<vmem>>, %arg8: memref<5x64x16xf32, #tpu.memory_space<vmem>>, %arg9: memref<5x1x16xf32, #tpu.memory_space<vmem>>, %arg10: memref<8x8xf32, #tpu.memory_space<vmem>>, %arg11: memref<8x1xf32, #tpu.memory_space<vmem>>) attributes {dimension_semantics = [#tpu.dimension_semantics<arbitrary>], iteration_bounds = array<i64: 1>, scalar_prefetch = 0 : i64, scratch_operands = 0 : i64, tpu.core_type = #tpu.core_type<tc>, window_params = [{pipeline_mode = #tpu.pipeline_mode<synchronous>, transform_indices = @transform_0, window_bounds = array<i64: 8, 8>}, {pipeline_mode = #tpu.pipeline_mode<synchronous>, transform_indices = @transform_1, window_bounds = array<i64: 8, 8>}, {pipeline_mode = #tpu.pipeline_mode<synchronous>, transform_indices = @transform_2, window_bounds = array<i64: 5, 8, 64>}, {pipeline_mode = #tpu.pipeline_mode<synchronous>, transform_indices = @transform_3, window_bounds = array<i64: 8, 320>}, {pipeline_mode = #tpu.pipeline_mode<synchronous>, transform_indices = @transform_4, window_bounds = array<i64: 1, 320>}, {pipeline_mode = #tpu.pipeline_mode<synchronous>, transform_indices = @transform_5, window_bounds = array<i64: 5, 64, 64>}, {pipeline_mode = #tpu.pipeline_mode<synchronous>, transform_indices = @transform_6, window_bounds = array<i64: 5, 1, 64>}, {pipeline_mode = #tpu.pipeline_mode<synchronous>, transform_indices = @transform_7, window_bounds = array<i64: 5, 64, 16>}, {pipeline_mode = #tpu.pipeline_mode<synchronous>, transform_indices = @transform_8, window_bounds = array<i64: 5, 1, 16>}, {pipeline_mode = #tpu.pipeline_mode<synchronous>, transform_indices = @transform_9, window_bounds = array<i64: 8, 8>}, {pipeline_mode = #tpu.pipeline_mode<synchronous>, transform_indices = @transform_10, window_bounds = array<i64: 8, 1>}]} {
    %c0 = arith.constant 0 : index
    %c0_0 = arith.constant 0 : index
    %0 = vector.load %arg1[%c0, %c0_0] : memref<8x8xf32, #tpu.memory_space<vmem>>, vector<8x8xf32>
    %c0_1 = arith.constant 0 : index
    %c0_2 = arith.constant 0 : index
    %1 = vector.load %arg2[%c0_1, %c0_2] : memref<8x8xf32, #tpu.memory_space<vmem>>, vector<8x8xf32>
    %c0_3 = arith.constant 0 : index
    %c0_4 = arith.constant 0 : index
    %2 = vector.load %arg4[%c0_3, %c0_4] : memref<8x320xf32, #tpu.memory_space<vmem>>, vector<8x320xf32>
    %cst = arith.constant dense<0.000000e+00> : vector<8x320xf32>
    %3 = tpu.matmul %1, %2, %cst {dimension_numbers = #tpu.dot_dimension_numbers<[1], [0], [0], [1], [0, 0, 1, 1], [], []>} : vector<8x8xf32>, vector<8x320xf32>, vector<8x320xf32> -> vector<8x320xf32>
    %c0_5 = arith.constant 0 : index
    %c0_6 = arith.constant 0 : index
    %4 = vector.load %arg5[%c0_5, %c0_6] : memref<1x320xf32, #tpu.memory_space<vmem>>, vector<1x320xf32>
    %5 = vector.broadcast %4 : vector<1x320xf32> to vector<8x320xf32>
    %6 = arith.addf %3, %5 : vector<8x320xf32>
    %cst_7 = arith.constant 0.000000e+00 : f32
    %7 = vector.broadcast %cst_7 : f32 to vector<8x1xf32>
    %c0_8 = arith.constant 0 : index
    %c0_9 = arith.constant 0 : index
    %c0_10 = arith.constant 0 : index
    %8 = vector.load %arg3[%c0_8, %c0_9, %c0_10] : memref<5x8x64xf32, #tpu.memory_space<vmem>>, vector<1x8x64xf32>
    %9 = vector.shape_cast %8 : vector<1x8x64xf32> to vector<8x64xf32>
    %cst_11 = arith.constant dense<0.000000e+00> : vector<8x64xf32>
    %10 = tpu.matmul %0, %9, %cst_11 {dimension_numbers = #tpu.dot_dimension_numbers<[1], [0], [0], [1], [0, 0, 1, 1], [], []>} : vector<8x8xf32>, vector<8x64xf32>, vector<8x64xf32> -> vector<8x64xf32>
    %11 = vector.extract_strided_slice %6 {offsets = [0, 0], sizes = [8, 64], strides = [1, 1]} : vector<8x320xf32> to vector<8x64xf32>
    %12 = arith.addf %10, %11 : vector<8x64xf32>
    %cst_12 = arith.constant 0.000000e+00 : f32
    %13 = vector.broadcast %cst_12 : f32 to vector<8x64xf32>
    %14 = arith.maximumf %12, %13 : vector<8x64xf32>
    %c0_13 = arith.constant 0 : index
    %c0_14 = arith.constant 0 : index
    %c0_15 = arith.constant 0 : index
    %15 = vector.load %arg6[%c0_13, %c0_14, %c0_15] : memref<5x64x64xf32, #tpu.memory_space<vmem>>, vector<1x64x64xf32>
    %16 = vector.shape_cast %15 : vector<1x64x64xf32> to vector<64x64xf32>
    %cst_16 = arith.constant dense<0.000000e+00> : vector<8x64xf32>
    %17 = tpu.matmul %14, %16, %cst_16 {dimension_numbers = #tpu.dot_dimension_numbers<[1], [0], [0], [1], [0, 0, 1, 1], [], []>} : vector<8x64xf32>, vector<64x64xf32>, vector<8x64xf32> -> vector<8x64xf32>
    %c0_17 = arith.constant 0 : index
    %c0_18 = arith.constant 0 : index
    %c0_19 = arith.constant 0 : index
    %18 = vector.load %arg7[%c0_17, %c0_18, %c0_19] : memref<5x1x64xf32, #tpu.memory_space<vmem>>, vector<1x1x64xf32>
    %19 = vector.shape_cast %18 : vector<1x1x64xf32> to vector<1x64xf32>
    %20 = vector.broadcast %19 : vector<1x64xf32> to vector<8x64xf32>
    %21 = arith.addf %17, %20 : vector<8x64xf32>
    %cst_20 = arith.constant 0.000000e+00 : f32
    %22 = vector.broadcast %cst_20 : f32 to vector<8x64xf32>
    %23 = arith.maximumf %21, %22 : vector<8x64xf32>
    %c0_21 = arith.constant 0 : index
    %c0_22 = arith.constant 0 : index
    %c0_23 = arith.constant 0 : index
    %24 = vector.load %arg8[%c0_21, %c0_22, %c0_23] : memref<5x64x16xf32, #tpu.memory_space<vmem>>, vector<1x64x16xf32>
    %25 = vector.shape_cast %24 : vector<1x64x16xf32> to vector<64x16xf32>
    %cst_24 = arith.constant dense<0.000000e+00> : vector<8x16xf32>
    %26 = tpu.matmul %23, %25, %cst_24 {dimension_numbers = #tpu.dot_dimension_numbers<[1], [0], [0], [1], [0, 0, 1, 1], [], []>} : vector<8x64xf32>, vector<64x16xf32>, vector<8x16xf32> -> vector<8x16xf32>
    %c0_25 = arith.constant 0 : index
    %c0_26 = arith.constant 0 : index
    %c0_27 = arith.constant 0 : index
    %27 = vector.load %arg9[%c0_25, %c0_26, %c0_27] : memref<5x1x16xf32, #tpu.memory_space<vmem>>, vector<1x1x16xf32>
    %28 = vector.shape_cast %27 : vector<1x1x16xf32> to vector<1x16xf32>
    %29 = vector.broadcast %28 : vector<1x16xf32> to vector<8x16xf32>
    %30 = arith.addf %26, %29 : vector<8x16xf32>
    %31 = vector.extract_strided_slice %30 {offsets = [0, 0], sizes = [8, 8], strides = [1, 1]} : vector<8x16xf32> to vector<8x8xf32>
    %32 = vector.extract_strided_slice %30 {offsets = [0, 8], sizes = [8, 8], strides = [1, 1]} : vector<8x16xf32> to vector<8x8xf32>
    %cst_28 = arith.constant 2.000000e+01 : f32
    %33 = vector.broadcast %cst_28 : f32 to vector<8x8xf32>
    %34 = arith.cmpf ogt, %32, %33 : vector<8x8xf32>
    %cst_29 = arith.constant 2.000000e+01 : f32
    %35 = vector.broadcast %cst_29 : f32 to vector<8x8xf32>
    %36 = arith.minimumf %32, %35 : vector<8x8xf32>
    %37 = math.exp %36 : vector<8x8xf32>
    %38 = math.log1p %37 : vector<8x8xf32>
    %39 = arith.select %34, %32, %38 : vector<8x8xi1>, vector<8x8xf32>
    %cst_30 = arith.constant 9.99999974E-6 : f32
    %40 = vector.broadcast %cst_30 : f32 to vector<8x8xf32>
    %41 = arith.addf %39, %40 : vector<8x8xf32>
    %42 = tpu.reciprocal %41 : vector<8x8xf32> -> vector<8x8xf32>
    %43 = arith.subf %0, %31 : vector<8x8xf32>
    %44 = arith.mulf %43, %42 : vector<8x8xf32>
    %45 = math.log %41 : vector<8x8xf32>
    %cst_31 = arith.constant dense<0.000000e+00> : vector<8xf32>
    %46 = vector.multi_reduction <add>, %45, %cst_31 [1] : vector<8x8xf32> to vector<8xf32>
    %47 = vector.shape_cast %46 : vector<8xf32> to vector<8x1xf32>
    %48 = arith.subf %7, %47 : vector<8x1xf32>
    %c1 = arith.constant 1 : index
    %c0_32 = arith.constant 0 : index
    %c0_33 = arith.constant 0 : index
    %49 = vector.load %arg3[%c1, %c0_32, %c0_33] : memref<5x8x64xf32, #tpu.memory_space<vmem>>, vector<1x8x64xf32>
    %50 = vector.shape_cast %49 : vector<1x8x64xf32> to vector<8x64xf32>
    %cst_34 = arith.constant dense<0.000000e+00> : vector<8x64xf32>
    %51 = tpu.matmul %44, %50, %cst_34 {dimension_numbers = #tpu.dot_dimension_numbers<[1], [0], [0], [1], [0, 0, 1, 1], [], []>} : vector<8x8xf32>, vector<8x64xf32>, vector<8x64xf32> -> vector<8x64xf32>
    %52 = vector.extract_strided_slice %6 {offsets = [0, 64], sizes = [8, 64], strides = [1, 1]} : vector<8x320xf32> to vector<8x64xf32>
    %53 = arith.addf %51, %52 : vector<8x64xf32>
    %cst_35 = arith.constant 0.000000e+00 : f32
    %54 = vector.broadcast %cst_35 : f32 to vector<8x64xf32>
    %55 = arith.maximumf %53, %54 : vector<8x64xf32>
    %c1_36 = arith.constant 1 : index
    %c0_37 = arith.constant 0 : index
    %c0_38 = arith.constant 0 : index
    %56 = vector.load %arg6[%c1_36, %c0_37, %c0_38] : memref<5x64x64xf32, #tpu.memory_space<vmem>>, vector<1x64x64xf32>
    %57 = vector.shape_cast %56 : vector<1x64x64xf32> to vector<64x64xf32>
    %cst_39 = arith.constant dense<0.000000e+00> : vector<8x64xf32>
    %58 = tpu.matmul %55, %57, %cst_39 {dimension_numbers = #tpu.dot_dimension_numbers<[1], [0], [0], [1], [0, 0, 1, 1], [], []>} : vector<8x64xf32>, vector<64x64xf32>, vector<8x64xf32> -> vector<8x64xf32>
    %c1_40 = arith.constant 1 : index
    %c0_41 = arith.constant 0 : index
    %c0_42 = arith.constant 0 : index
    %59 = vector.load %arg7[%c1_40, %c0_41, %c0_42] : memref<5x1x64xf32, #tpu.memory_space<vmem>>, vector<1x1x64xf32>
    %60 = vector.shape_cast %59 : vector<1x1x64xf32> to vector<1x64xf32>
    %61 = vector.broadcast %60 : vector<1x64xf32> to vector<8x64xf32>
    %62 = arith.addf %58, %61 : vector<8x64xf32>
    %cst_43 = arith.constant 0.000000e+00 : f32
    %63 = vector.broadcast %cst_43 : f32 to vector<8x64xf32>
    %64 = arith.maximumf %62, %63 : vector<8x64xf32>
    %c1_44 = arith.constant 1 : index
    %c0_45 = arith.constant 0 : index
    %c0_46 = arith.constant 0 : index
    %65 = vector.load %arg8[%c1_44, %c0_45, %c0_46] : memref<5x64x16xf32, #tpu.memory_space<vmem>>, vector<1x64x16xf32>
    %66 = vector.shape_cast %65 : vector<1x64x16xf32> to vector<64x16xf32>
    %cst_47 = arith.constant dense<0.000000e+00> : vector<8x16xf32>
    %67 = tpu.matmul %64, %66, %cst_47 {dimension_numbers = #tpu.dot_dimension_numbers<[1], [0], [0], [1], [0, 0, 1, 1], [], []>} : vector<8x64xf32>, vector<64x16xf32>, vector<8x16xf32> -> vector<8x16xf32>
    %c1_48 = arith.constant 1 : index
    %c0_49 = arith.constant 0 : index
    %c0_50 = arith.constant 0 : index
    %68 = vector.load %arg9[%c1_48, %c0_49, %c0_50] : memref<5x1x16xf32, #tpu.memory_space<vmem>>, vector<1x1x16xf32>
    %69 = vector.shape_cast %68 : vector<1x1x16xf32> to vector<1x16xf32>
    %70 = vector.broadcast %69 : vector<1x16xf32> to vector<8x16xf32>
    %71 = arith.addf %67, %70 : vector<8x16xf32>
    %72 = vector.extract_strided_slice %71 {offsets = [0, 0], sizes = [8, 8], strides = [1, 1]} : vector<8x16xf32> to vector<8x8xf32>
    %73 = vector.extract_strided_slice %71 {offsets = [0, 8], sizes = [8, 8], strides = [1, 1]} : vector<8x16xf32> to vector<8x8xf32>
    %cst_51 = arith.constant 2.000000e+01 : f32
    %74 = vector.broadcast %cst_51 : f32 to vector<8x8xf32>
    %75 = arith.cmpf ogt, %73, %74 : vector<8x8xf32>
    %cst_52 = arith.constant 2.000000e+01 : f32
    %76 = vector.broadcast %cst_52 : f32 to vector<8x8xf32>
    %77 = arith.minimumf %73, %76 : vector<8x8xf32>
    %78 = math.exp %77 : vector<8x8xf32>
    %79 = math.log1p %78 : vector<8x8xf32>
    %80 = arith.select %75, %73, %79 : vector<8x8xi1>, vector<8x8xf32>
    %cst_53 = arith.constant 9.99999974E-6 : f32
    %81 = vector.broadcast %cst_53 : f32 to vector<8x8xf32>
    %82 = arith.addf %80, %81 : vector<8x8xf32>
    %83 = tpu.reciprocal %82 : vector<8x8xf32> -> vector<8x8xf32>
    %84 = arith.subf %44, %72 : vector<8x8xf32>
    %85 = arith.mulf %84, %83 : vector<8x8xf32>
    %86 = math.log %82 : vector<8x8xf32>
    %cst_54 = arith.constant dense<0.000000e+00> : vector<8xf32>
    %87 = vector.multi_reduction <add>, %86, %cst_54 [1] : vector<8x8xf32> to vector<8xf32>
    %88 = vector.shape_cast %87 : vector<8xf32> to vector<8x1xf32>
    %89 = arith.subf %48, %88 : vector<8x1xf32>
    %c2 = arith.constant 2 : index
    %c0_55 = arith.constant 0 : index
    %c0_56 = arith.constant 0 : index
    %90 = vector.load %arg3[%c2, %c0_55, %c0_56] : memref<5x8x64xf32, #tpu.memory_space<vmem>>, vector<1x8x64xf32>
    %91 = vector.shape_cast %90 : vector<1x8x64xf32> to vector<8x64xf32>
    %cst_57 = arith.constant dense<0.000000e+00> : vector<8x64xf32>
    %92 = tpu.matmul %85, %91, %cst_57 {dimension_numbers = #tpu.dot_dimension_numbers<[1], [0], [0], [1], [0, 0, 1, 1], [], []>} : vector<8x8xf32>, vector<8x64xf32>, vector<8x64xf32> -> vector<8x64xf32>
    %93 = vector.extract_strided_slice %6 {offsets = [0, 128], sizes = [8, 64], strides = [1, 1]} : vector<8x320xf32> to vector<8x64xf32>
    %94 = arith.addf %92, %93 : vector<8x64xf32>
    %cst_58 = arith.constant 0.000000e+00 : f32
    %95 = vector.broadcast %cst_58 : f32 to vector<8x64xf32>
    %96 = arith.maximumf %94, %95 : vector<8x64xf32>
    %c2_59 = arith.constant 2 : index
    %c0_60 = arith.constant 0 : index
    %c0_61 = arith.constant 0 : index
    %97 = vector.load %arg6[%c2_59, %c0_60, %c0_61] : memref<5x64x64xf32, #tpu.memory_space<vmem>>, vector<1x64x64xf32>
    %98 = vector.shape_cast %97 : vector<1x64x64xf32> to vector<64x64xf32>
    %cst_62 = arith.constant dense<0.000000e+00> : vector<8x64xf32>
    %99 = tpu.matmul %96, %98, %cst_62 {dimension_numbers = #tpu.dot_dimension_numbers<[1], [0], [0], [1], [0, 0, 1, 1], [], []>} : vector<8x64xf32>, vector<64x64xf32>, vector<8x64xf32> -> vector<8x64xf32>
    %c2_63 = arith.constant 2 : index
    %c0_64 = arith.constant 0 : index
    %c0_65 = arith.constant 0 : index
    %100 = vector.load %arg7[%c2_63, %c0_64, %c0_65] : memref<5x1x64xf32, #tpu.memory_space<vmem>>, vector<1x1x64xf32>
    %101 = vector.shape_cast %100 : vector<1x1x64xf32> to vector<1x64xf32>
    %102 = vector.broadcast %101 : vector<1x64xf32> to vector<8x64xf32>
    %103 = arith.addf %99, %102 : vector<8x64xf32>
    %cst_66 = arith.constant 0.000000e+00 : f32
    %104 = vector.broadcast %cst_66 : f32 to vector<8x64xf32>
    %105 = arith.maximumf %103, %104 : vector<8x64xf32>
    %c2_67 = arith.constant 2 : index
    %c0_68 = arith.constant 0 : index
    %c0_69 = arith.constant 0 : index
    %106 = vector.load %arg8[%c2_67, %c0_68, %c0_69] : memref<5x64x16xf32, #tpu.memory_space<vmem>>, vector<1x64x16xf32>
    %107 = vector.shape_cast %106 : vector<1x64x16xf32> to vector<64x16xf32>
    %cst_70 = arith.constant dense<0.000000e+00> : vector<8x16xf32>
    %108 = tpu.matmul %105, %107, %cst_70 {dimension_numbers = #tpu.dot_dimension_numbers<[1], [0], [0], [1], [0, 0, 1, 1], [], []>} : vector<8x64xf32>, vector<64x16xf32>, vector<8x16xf32> -> vector<8x16xf32>
    %c2_71 = arith.constant 2 : index
    %c0_72 = arith.constant 0 : index
    %c0_73 = arith.constant 0 : index
    %109 = vector.load %arg9[%c2_71, %c0_72, %c0_73] : memref<5x1x16xf32, #tpu.memory_space<vmem>>, vector<1x1x16xf32>
    %110 = vector.shape_cast %109 : vector<1x1x16xf32> to vector<1x16xf32>
    %111 = vector.broadcast %110 : vector<1x16xf32> to vector<8x16xf32>
    %112 = arith.addf %108, %111 : vector<8x16xf32>
    %113 = vector.extract_strided_slice %112 {offsets = [0, 0], sizes = [8, 8], strides = [1, 1]} : vector<8x16xf32> to vector<8x8xf32>
    %114 = vector.extract_strided_slice %112 {offsets = [0, 8], sizes = [8, 8], strides = [1, 1]} : vector<8x16xf32> to vector<8x8xf32>
    %cst_74 = arith.constant 2.000000e+01 : f32
    %115 = vector.broadcast %cst_74 : f32 to vector<8x8xf32>
    %116 = arith.cmpf ogt, %114, %115 : vector<8x8xf32>
    %cst_75 = arith.constant 2.000000e+01 : f32
    %117 = vector.broadcast %cst_75 : f32 to vector<8x8xf32>
    %118 = arith.minimumf %114, %117 : vector<8x8xf32>
    %119 = math.exp %118 : vector<8x8xf32>
    %120 = math.log1p %119 : vector<8x8xf32>
    %121 = arith.select %116, %114, %120 : vector<8x8xi1>, vector<8x8xf32>
    %cst_76 = arith.constant 9.99999974E-6 : f32
    %122 = vector.broadcast %cst_76 : f32 to vector<8x8xf32>
    %123 = arith.addf %121, %122 : vector<8x8xf32>
    %124 = tpu.reciprocal %123 : vector<8x8xf32> -> vector<8x8xf32>
    %125 = arith.subf %85, %113 : vector<8x8xf32>
    %126 = arith.mulf %125, %124 : vector<8x8xf32>
    %127 = math.log %123 : vector<8x8xf32>
    %cst_77 = arith.constant dense<0.000000e+00> : vector<8xf32>
    %128 = vector.multi_reduction <add>, %127, %cst_77 [1] : vector<8x8xf32> to vector<8xf32>
    %129 = vector.shape_cast %128 : vector<8xf32> to vector<8x1xf32>
    %130 = arith.subf %89, %129 : vector<8x1xf32>
    %c3 = arith.constant 3 : index
    %c0_78 = arith.constant 0 : index
    %c0_79 = arith.constant 0 : index
    %131 = vector.load %arg3[%c3, %c0_78, %c0_79] : memref<5x8x64xf32, #tpu.memory_space<vmem>>, vector<1x8x64xf32>
    %132 = vector.shape_cast %131 : vector<1x8x64xf32> to vector<8x64xf32>
    %cst_80 = arith.constant dense<0.000000e+00> : vector<8x64xf32>
    %133 = tpu.matmul %126, %132, %cst_80 {dimension_numbers = #tpu.dot_dimension_numbers<[1], [0], [0], [1], [0, 0, 1, 1], [], []>} : vector<8x8xf32>, vector<8x64xf32>, vector<8x64xf32> -> vector<8x64xf32>
    %134 = vector.extract_strided_slice %6 {offsets = [0, 192], sizes = [8, 64], strides = [1, 1]} : vector<8x320xf32> to vector<8x64xf32>
    %135 = arith.addf %133, %134 : vector<8x64xf32>
    %cst_81 = arith.constant 0.000000e+00 : f32
    %136 = vector.broadcast %cst_81 : f32 to vector<8x64xf32>
    %137 = arith.maximumf %135, %136 : vector<8x64xf32>
    %c3_82 = arith.constant 3 : index
    %c0_83 = arith.constant 0 : index
    %c0_84 = arith.constant 0 : index
    %138 = vector.load %arg6[%c3_82, %c0_83, %c0_84] : memref<5x64x64xf32, #tpu.memory_space<vmem>>, vector<1x64x64xf32>
    %139 = vector.shape_cast %138 : vector<1x64x64xf32> to vector<64x64xf32>
    %cst_85 = arith.constant dense<0.000000e+00> : vector<8x64xf32>
    %140 = tpu.matmul %137, %139, %cst_85 {dimension_numbers = #tpu.dot_dimension_numbers<[1], [0], [0], [1], [0, 0, 1, 1], [], []>} : vector<8x64xf32>, vector<64x64xf32>, vector<8x64xf32> -> vector<8x64xf32>
    %c3_86 = arith.constant 3 : index
    %c0_87 = arith.constant 0 : index
    %c0_88 = arith.constant 0 : index
    %141 = vector.load %arg7[%c3_86, %c0_87, %c0_88] : memref<5x1x64xf32, #tpu.memory_space<vmem>>, vector<1x1x64xf32>
    %142 = vector.shape_cast %141 : vector<1x1x64xf32> to vector<1x64xf32>
    %143 = vector.broadcast %142 : vector<1x64xf32> to vector<8x64xf32>
    %144 = arith.addf %140, %143 : vector<8x64xf32>
    %cst_89 = arith.constant 0.000000e+00 : f32
    %145 = vector.broadcast %cst_89 : f32 to vector<8x64xf32>
    %146 = arith.maximumf %144, %145 : vector<8x64xf32>
    %c3_90 = arith.constant 3 : index
    %c0_91 = arith.constant 0 : index
    %c0_92 = arith.constant 0 : index
    %147 = vector.load %arg8[%c3_90, %c0_91, %c0_92] : memref<5x64x16xf32, #tpu.memory_space<vmem>>, vector<1x64x16xf32>
    %148 = vector.shape_cast %147 : vector<1x64x16xf32> to vector<64x16xf32>
    %cst_93 = arith.constant dense<0.000000e+00> : vector<8x16xf32>
    %149 = tpu.matmul %146, %148, %cst_93 {dimension_numbers = #tpu.dot_dimension_numbers<[1], [0], [0], [1], [0, 0, 1, 1], [], []>} : vector<8x64xf32>, vector<64x16xf32>, vector<8x16xf32> -> vector<8x16xf32>
    %c3_94 = arith.constant 3 : index
    %c0_95 = arith.constant 0 : index
    %c0_96 = arith.constant 0 : index
    %150 = vector.load %arg9[%c3_94, %c0_95, %c0_96] : memref<5x1x16xf32, #tpu.memory_space<vmem>>, vector<1x1x16xf32>
    %151 = vector.shape_cast %150 : vector<1x1x16xf32> to vector<1x16xf32>
    %152 = vector.broadcast %151 : vector<1x16xf32> to vector<8x16xf32>
    %153 = arith.addf %149, %152 : vector<8x16xf32>
    %154 = vector.extract_strided_slice %153 {offsets = [0, 0], sizes = [8, 8], strides = [1, 1]} : vector<8x16xf32> to vector<8x8xf32>
    %155 = vector.extract_strided_slice %153 {offsets = [0, 8], sizes = [8, 8], strides = [1, 1]} : vector<8x16xf32> to vector<8x8xf32>
    %cst_97 = arith.constant 2.000000e+01 : f32
    %156 = vector.broadcast %cst_97 : f32 to vector<8x8xf32>
    %157 = arith.cmpf ogt, %155, %156 : vector<8x8xf32>
    %cst_98 = arith.constant 2.000000e+01 : f32
    %158 = vector.broadcast %cst_98 : f32 to vector<8x8xf32>
    %159 = arith.minimumf %155, %158 : vector<8x8xf32>
    %160 = math.exp %159 : vector<8x8xf32>
    %161 = math.log1p %160 : vector<8x8xf32>
    %162 = arith.select %157, %155, %161 : vector<8x8xi1>, vector<8x8xf32>
    %cst_99 = arith.constant 9.99999974E-6 : f32
    %163 = vector.broadcast %cst_99 : f32 to vector<8x8xf32>
    %164 = arith.addf %162, %163 : vector<8x8xf32>
    %165 = tpu.reciprocal %164 : vector<8x8xf32> -> vector<8x8xf32>
    %166 = arith.subf %126, %154 : vector<8x8xf32>
    %167 = arith.mulf %166, %165 : vector<8x8xf32>
    %168 = math.log %164 : vector<8x8xf32>
    %cst_100 = arith.constant dense<0.000000e+00> : vector<8xf32>
    %169 = vector.multi_reduction <add>, %168, %cst_100 [1] : vector<8x8xf32> to vector<8xf32>
    %170 = vector.shape_cast %169 : vector<8xf32> to vector<8x1xf32>
    %171 = arith.subf %130, %170 : vector<8x1xf32>
    %c4 = arith.constant 4 : index
    %c0_101 = arith.constant 0 : index
    %c0_102 = arith.constant 0 : index
    %172 = vector.load %arg3[%c4, %c0_101, %c0_102] : memref<5x8x64xf32, #tpu.memory_space<vmem>>, vector<1x8x64xf32>
    %173 = vector.shape_cast %172 : vector<1x8x64xf32> to vector<8x64xf32>
    %cst_103 = arith.constant dense<0.000000e+00> : vector<8x64xf32>
    %174 = tpu.matmul %167, %173, %cst_103 {dimension_numbers = #tpu.dot_dimension_numbers<[1], [0], [0], [1], [0, 0, 1, 1], [], []>} : vector<8x8xf32>, vector<8x64xf32>, vector<8x64xf32> -> vector<8x64xf32>
    %175 = vector.extract_strided_slice %6 {offsets = [0, 256], sizes = [8, 64], strides = [1, 1]} : vector<8x320xf32> to vector<8x64xf32>
    %176 = arith.addf %174, %175 : vector<8x64xf32>
    %cst_104 = arith.constant 0.000000e+00 : f32
    %177 = vector.broadcast %cst_104 : f32 to vector<8x64xf32>
    %178 = arith.maximumf %176, %177 : vector<8x64xf32>
    %c4_105 = arith.constant 4 : index
    %c0_106 = arith.constant 0 : index
    %c0_107 = arith.constant 0 : index
    %179 = vector.load %arg6[%c4_105, %c0_106, %c0_107] : memref<5x64x64xf32, #tpu.memory_space<vmem>>, vector<1x64x64xf32>
    %180 = vector.shape_cast %179 : vector<1x64x64xf32> to vector<64x64xf32>
    %cst_108 = arith.constant dense<0.000000e+00> : vector<8x64xf32>
    %181 = tpu.matmul %178, %180, %cst_108 {dimension_numbers = #tpu.dot_dimension_numbers<[1], [0], [0], [1], [0, 0, 1, 1], [], []>} : vector<8x64xf32>, vector<64x64xf32>, vector<8x64xf32> -> vector<8x64xf32>
    %c4_109 = arith.constant 4 : index
    %c0_110 = arith.constant 0 : index
    %c0_111 = arith.constant 0 : index
    %182 = vector.load %arg7[%c4_109, %c0_110, %c0_111] : memref<5x1x64xf32, #tpu.memory_space<vmem>>, vector<1x1x64xf32>
    %183 = vector.shape_cast %182 : vector<1x1x64xf32> to vector<1x64xf32>
    %184 = vector.broadcast %183 : vector<1x64xf32> to vector<8x64xf32>
    %185 = arith.addf %181, %184 : vector<8x64xf32>
    %cst_112 = arith.constant 0.000000e+00 : f32
    %186 = vector.broadcast %cst_112 : f32 to vector<8x64xf32>
    %187 = arith.maximumf %185, %186 : vector<8x64xf32>
    %c4_113 = arith.constant 4 : index
    %c0_114 = arith.constant 0 : index
    %c0_115 = arith.constant 0 : index
    %188 = vector.load %arg8[%c4_113, %c0_114, %c0_115] : memref<5x64x16xf32, #tpu.memory_space<vmem>>, vector<1x64x16xf32>
    %189 = vector.shape_cast %188 : vector<1x64x16xf32> to vector<64x16xf32>
    %cst_116 = arith.constant dense<0.000000e+00> : vector<8x16xf32>
    %190 = tpu.matmul %187, %189, %cst_116 {dimension_numbers = #tpu.dot_dimension_numbers<[1], [0], [0], [1], [0, 0, 1, 1], [], []>} : vector<8x64xf32>, vector<64x16xf32>, vector<8x16xf32> -> vector<8x16xf32>
    %c4_117 = arith.constant 4 : index
    %c0_118 = arith.constant 0 : index
    %c0_119 = arith.constant 0 : index
    %191 = vector.load %arg9[%c4_117, %c0_118, %c0_119] : memref<5x1x16xf32, #tpu.memory_space<vmem>>, vector<1x1x16xf32>
    %192 = vector.shape_cast %191 : vector<1x1x16xf32> to vector<1x16xf32>
    %193 = vector.broadcast %192 : vector<1x16xf32> to vector<8x16xf32>
    %194 = arith.addf %190, %193 : vector<8x16xf32>
    %195 = vector.extract_strided_slice %194 {offsets = [0, 0], sizes = [8, 8], strides = [1, 1]} : vector<8x16xf32> to vector<8x8xf32>
    %196 = vector.extract_strided_slice %194 {offsets = [0, 8], sizes = [8, 8], strides = [1, 1]} : vector<8x16xf32> to vector<8x8xf32>
    %cst_120 = arith.constant 2.000000e+01 : f32
    %197 = vector.broadcast %cst_120 : f32 to vector<8x8xf32>
    %198 = arith.cmpf ogt, %196, %197 : vector<8x8xf32>
    %cst_121 = arith.constant 2.000000e+01 : f32
    %199 = vector.broadcast %cst_121 : f32 to vector<8x8xf32>
    %200 = arith.minimumf %196, %199 : vector<8x8xf32>
    %201 = math.exp %200 : vector<8x8xf32>
    %202 = math.log1p %201 : vector<8x8xf32>
    %203 = arith.select %198, %196, %202 : vector<8x8xi1>, vector<8x8xf32>
    %cst_122 = arith.constant 9.99999974E-6 : f32
    %204 = vector.broadcast %cst_122 : f32 to vector<8x8xf32>
    %205 = arith.addf %203, %204 : vector<8x8xf32>
    %206 = tpu.reciprocal %205 : vector<8x8xf32> -> vector<8x8xf32>
    %207 = arith.subf %167, %195 : vector<8x8xf32>
    %208 = arith.mulf %207, %206 : vector<8x8xf32>
    %209 = math.log %205 : vector<8x8xf32>
    %cst_123 = arith.constant dense<0.000000e+00> : vector<8xf32>
    %210 = vector.multi_reduction <add>, %209, %cst_123 [1] : vector<8x8xf32> to vector<8xf32>
    %211 = vector.shape_cast %210 : vector<8xf32> to vector<8x1xf32>
    %212 = arith.subf %171, %211 : vector<8x1xf32>
    %c0_124 = arith.constant 0 : index
    %c0_125 = arith.constant 0 : index
    %213 = vector.load %arg10[%c0_124, %c0_125] : memref<8x8xf32, #tpu.memory_space<vmem>>, vector<8x8xf32>
    tpu.vector_store %arg10[%c0_124, %c0_125], %208 {strides = array<i32>} : memref<8x8xf32, #tpu.memory_space<vmem>>, vector<8x8xf32>,
    %c0_126 = arith.constant 0 : index
    %c0_127 = arith.constant 0 : index
    %214 = vector.load %arg11[%c0_126, %c0_127] : memref<8x1xf32, #tpu.memory_space<vmem>>, vector<8x1xf32>
    tpu.vector_store %arg11[%c0_126, %c0_127], %212 {strides = array<i32>} : memref<8x1xf32, #tpu.memory_space<vmem>>, vector<8x1xf32>,
    return
  }
  func.func @transform_0(%arg0: i32) -> (i32, i32) {
    %c0_i32 = arith.constant 0 : i32
    %c0_i32_0 = arith.constant 0 : i32
    %c0_i32_1 = arith.constant 0 : i32
    return %c0_i32, %c0_i32_0 : i32, i32
  }
  func.func @transform_1(%arg0: i32) -> (i32, i32) {
    %c0_i32 = arith.constant 0 : i32
    %c0_i32_0 = arith.constant 0 : i32
    %c0_i32_1 = arith.constant 0 : i32
    return %c0_i32, %c0_i32_0 : i32, i32
  }
  func.func @transform_2(%arg0: i32) -> (i32, i32, i32) {
    %c0_i32 = arith.constant 0 : i32
    %c0_i32_0 = arith.constant 0 : i32
    %c0_i32_1 = arith.constant 0 : i32
    %c0_i32_2 = arith.constant 0 : i32
    return %c0_i32, %c0_i32_0, %c0_i32_1 : i32, i32, i32
  }
  func.func @transform_3(%arg0: i32) -> (i32, i32) {
    %c0_i32 = arith.constant 0 : i32
    %c0_i32_0 = arith.constant 0 : i32
    %c0_i32_1 = arith.constant 0 : i32
    return %c0_i32, %c0_i32_0 : i32, i32
  }
  func.func @transform_4(%arg0: i32) -> (i32, i32) {
    %c0_i32 = arith.constant 0 : i32
    %c0_i32_0 = arith.constant 0 : i32
    %c0_i32_1 = arith.constant 0 : i32
    return %c0_i32, %c0_i32_0 : i32, i32
  }
  func.func @transform_5(%arg0: i32) -> (i32, i32, i32) {
    %c0_i32 = arith.constant 0 : i32
    %c0_i32_0 = arith.constant 0 : i32
    %c0_i32_1 = arith.constant 0 : i32
    %c0_i32_2 = arith.constant 0 : i32
    return %c0_i32, %c0_i32_0, %c0_i32_1 : i32, i32, i32
  }
  func.func @transform_6(%arg0: i32) -> (i32, i32, i32) {
    %c0_i32 = arith.constant 0 : i32
    %c0_i32_0 = arith.constant 0 : i32
    %c0_i32_1 = arith.constant 0 : i32
    %c0_i32_2 = arith.constant 0 : i32
    return %c0_i32, %c0_i32_0, %c0_i32_1 : i32, i32, i32
  }
  func.func @transform_7(%arg0: i32) -> (i32, i32, i32) {
    %c0_i32 = arith.constant 0 : i32
    %c0_i32_0 = arith.constant 0 : i32
    %c0_i32_1 = arith.constant 0 : i32
    %c0_i32_2 = arith.constant 0 : i32
    return %c0_i32, %c0_i32_0, %c0_i32_1 : i32, i32, i32
  }
  func.func @transform_8(%arg0: i32) -> (i32, i32, i32) {
    %c0_i32 = arith.constant 0 : i32
    %c0_i32_0 = arith.constant 0 : i32
    %c0_i32_1 = arith.constant 0 : i32
    %c0_i32_2 = arith.constant 0 : i32
    return %c0_i32, %c0_i32_0, %c0_i32_1 : i32, i32, i32
  }
  func.func @transform_9(%arg0: i32) -> (i32, i32) {
    %c0_i32 = arith.constant 0 : i32
    %c0_i32_0 = arith.constant 0 : i32
    %c0_i32_1 = arith.constant 0 : i32
    return %c0_i32, %c0_i32_0 : i32, i32
  }
  func.func @transform_10(%arg0: i32) -> (i32, i32) {
    %c0_i32 = arith.constant 0 : i32
    %c0_i32_0 = arith.constant 0 : i32
    %c0_i32_1 = arith.constant 0 : i32
    return %c0_i32, %c0_i32_0 : i32, i32
  }
}

</mosaic_0001>

<bundles_post_ra>
// kernel: tpu_custom_call.1
= control target key start
LH: loop header
LB: loop body
LE: loop exit
PB: predicated region body
PF: predicated region fallthrough
CT: control target
= control target key end

     0   :  { %16 = vsyncpa [#allocation3], 0  ;;  %s2773_s0 = inlined_call_operand.vmem [shape: f32[8,8], index: 0, kind: input, shape index: {}]   ;;  %s2774_s1 = inlined_call_operand.vmem [shape: f32[8,8], index: 1, kind: input, shape index: {}]   ;;  %s2775_s2 = inlined_call_operand.vmem [shape: f32[5,8,64], index: 2, kind: input, shape index: {}]   ;;  %s2776_s3 = inlined_call_operand.vmem [shape: f32[8,320], index: 3, kind: input, shape index: {}]   ;;  %s2777_s4 = inlined_call_operand.hbm [shape: f32[1,320], index: 4, kind: input, shape index: {}]   ;;  %s2778_s5 = inlined_call_operand.vmem [shape: f32[5,64,64], index: 5, kind: input, shape index: {}]   ;;  %s2779_s6 = inlined_call_operand.vmem [shape: f32[5,1,64], index: 6, kind: input, shape index: {}]   ;;  %s2780_s7 = inlined_call_operand.vmem [shape: f32[5,64,16], index: 7, kind: input, shape index: {}]   ;;  %s2781_s8 = inlined_call_operand.vmem [shape: f32[5,1,16], index: 8, kind: input, shape index: {}]   ;;  %s2782_s9 = inlined_call_operand.hbm [shape: f32[8,8], index: 9, kind: output, shape index: {0}]   ;;  %s2783_s10 = inlined_call_operand.vmem [shape: f32[8,1], index: 10, kind: output, shape index: {1}]  }
   0x1   :  { %17 = vsyncpa [#allocation4], 0  ;;  %s2200_s13 = smov [#allocation2]  }
   0x2   :  { %s32_s14 = sshll.u32 %s2200_s13, 4  ;;  %s33_s14 = int_to_ptr.vmem [resolvable:$true] %s32_s14 }
   0x3   :  { %s2164_s15 = scalar_lea.vmem %s33_s14, 48  ;;  %s2168_s16 = scalar_lea.vmem %s33_s14, 64 }
   0x4   :  { %p2165_p0 = scmp.ne.s32.totalorder %s33_s14, %s2164_s15  ;;  %p2169_p1 = scmp.lt.s32.totalorder %s33_s14, %s33_s14 }
   0x5   :  { %p2170_p2 = scmp.lt.s32.totalorder %s2168_s16, %s2164_s15 }
   0x7   :  { %p2171_p3 = por %p2170_p2, %p2169_p1 }
   0x9   :  { %p2172_p4 = pnand %p2171_p3, %p2165_p0 }
   0xb   :  { %2175 = shalt.err (!%p2172_p4)
}
   0xc   :  { %35 = dma.hbm_to_vmem [thread:$0]  %s2777_s4, 48, %s33_s14, [#allocation3]  }
   0xd   :  { %2196 = dma.done.wait [#allocation3], 48  }
   0xe   :  { %2197 = vsyncadd [#allocation3], 4294967248  ;;  %v2201_v0 = vmov 0.0   ;;  %vm2202_vm0 = vmmov 0   ;;  %v50_v1 = vld [vmem:[%s2776_s3 + $0x8] sm:$0xff]  ;;  %v49_v2 = vld [vmem:[%s2776_s3] sm:$0xff]  ;;  %v54_v20 = vlaneseq }
   0xf   :  { %137 = vmatprep.mubr.f32.mxu0 %v2201_v0  ;;  %1890 = vmatprep.subr.mxu1 %v2201_v0  ;;  %v48_v3 = vld [vmem:[%s2774_s1] sm:$0xff]  ;;  %vm69_vm1 = vcmask 64512   ;;  %v51_v5 = vld [vmem:[%s2776_s3 + $0x10] sm:$0xff]  ;;  %v296_v6 = vld [vmem:[%s2778_s5 + $0x38] sm:$0xff]  ;;  %vm304_vm2 = vcmask 523264   ;;  %s2203_s24 = smov 120  }
  0x10   :  { %1892 = vmatprep.mubr.msk.f32.mxu1 %vm2202_vm0, %v2201_v0  ;;  %103 = vmatprep.subr.mxu0 %v50_v1  ;;  %v214_v4 = vld [vmem:[%s2775_s2] sm:$0xff]  ;;  %v295_v8 = vld [vmem:[%s2778_s5 + $0x30] sm:$0xff]  ;;  %v294_v9 = vld [vmem:[%s2778_s5 + $0x28] sm:$0xff]  ;;  %v2353_v21 = vshrl.u32 %v54_v20, 7  ;;  %s2204_s29 = smov 64  }
  0x11   :  { %104 = vmatpush1.msra.mxu0 %v49_v2  ;;  %1891 = vmatpush3.msra.mxu1 %v51_v5  ;;  %v2293_v7 = vld [vmem:[%s2773_s0] sm:$0xff]  ;;  %v292_v11 = vld [vmem:[%s2778_s5 + $0x18] sm:$0xff]  ;;  %v291_v12 = vld [vmem:[%s2778_s5 + $0x10] sm:$0xff] }
  0x12   :  { %1685 = vmatmul.mubr.msk.f32.vlgmr.msra.gmra.mxu0 %vm69_vm1, %v48_v3  ;;  %1895 = vmatprep.subr.mxu0 %v2201_v0  ;;  %v293_v10 = vld [vmem:[%s2778_s5 + $0x20] sm:$0xff]  ;;  %v290_v13 = vld [vmem:[%s2778_s5 + $0x8] sm:$0xff]  ;;  %v386_v15 = vld [vmem:[%s2780_s7 + $0x38] sm:$0xff]  ;;  %v56_v22 = vsub.s32 0, %v2353_v21  ;;  %v60_v60 = vsub.s32 1, %v2353_v21 }
  0x13   :  { %1896 = vmatpush3.msra.mxu0 %v214_v4  ;;  %1897 = vmatprep.mubr.msk.f32.mxu0 %vm2202_vm0, %v2201_v0  ;;  %v289_v14 = vld [vmem:[%s2778_s5] sm:$0xff]  ;;  %v385_v16 = vld [vmem:[%s2780_s7 + $0x30] sm:$0xff]  ;;  %v384_v17 = vld [vmem:[%s2780_s7 + $0x28] sm:$0xff] }
  0x14   :  { %1893 = vmatmul.mubr.msk.f32.vlgmr.msra.gmra.mxu1 %vm69_vm1, %v48_v3  ;;  %1900 = vmatprep.subr.mxu1 %v2201_v0  ;;  %v383_v18 = vld [vmem:[%s2780_s7 + $0x20] sm:$0xff]  ;;  %v382_v19 = vld [vmem:[%s2780_s7 + $0x18] sm:$0xff]  ;;  %v381_v34 = vld [vmem:[%s2780_s7 + $0x10] sm:$0xff] }
  0x15   :  { %1901 = vmatpush3.msra.mxu1 %v296_v6  ;;  %1916 = vmatprep.mubr.msk.f32.mxu1 %vm2202_vm0, %v2201_v0  ;;  %v2356_v23 = vld [vmem:[#allocation2] sm:$0x7]  ;;  %v380_v35 = vld [vmem:[%s2780_s7 + $0x8] sm:$0xff]  ;;  %v1701_v61 = vld [vmem:[%s2778_s5 + $0x78] sm:$0xff] }
  0x16   :  { %1898 = vmatmul.mubr.msk.f32.vlgmr.msra.gmra.mxu0 %vm69_vm1, %v2293_v7  ;;  %1902 = vmatprep.subr.mxu1 %v2201_v0  ;;  %v57_v24 = vrot.slane %v2356_v23, %v56_v22  ;;  %v379_v36 = vld [vmem:[%s2780_s7] sm:$0xff]  ;;  %v1692_v42 = vld [vmem:[%s2775_s2 + $0x8] sm:$0xff]  ;;  %v1700_v62 = vld [vmem:[%s2778_s5 + $0x70] sm:$0xff]  ;;  %v61_v2 = vrot.slane %v2356_v23, %v60_v60 }
  0x17   :  { %1903 = vmatpush3.msra.mxu1 %v295_v8  ;;  %1919 = vmatprep.subr.mxu0 %v2201_v0  ;;  %v1688_v37 = vld [vmem:[%s2779_s6] ss:$0 sm:$0xff]  ;;  %v1699_v1 = vld [vmem:[%s2778_s5 + $0x68] sm:$0xff]  ;;  %v1697_v4 = vld [vmem:[%s2778_s5 + $0x58] sm:$0xff] }
  0x18   :  { %1904 = vmatprep.subr.mxu1 %v2201_v0  ;;  %1935 = vmatprep.mubr.msk.f32.mxu0 %vm2202_vm0, %v2201_v0  ;;  %v1690_v43 = vld [vmem:[%s2781_s8] ss:$0 sm:$0xff] }
  0x19   :  { %1905 = vmatpush3.msra.mxu1 %v294_v9  ;;  %1920 = vmatpush3.msra.mxu0 %v386_v15  ;;  %v1698_v3 = vld [vmem:[%s2778_s5 + $0x60] sm:$0xff]  ;;  %v1711_v15 = vld [vmem:[%s2780_s7 + $0x70] sm:$0xff] }
  0x1a   :  { %1906 = vmatprep.subr.mxu1 %v2201_v0  ;;  %1921 = vmatprep.subr.mxu0 %v2201_v0 }
  0x1b   :  { %1907 = vmatpush3.msra.mxu1 %v293_v10  ;;  %1922 = vmatpush3.msra.mxu0 %v385_v16  ;;  %v1710_v16 = vld [vmem:[%s2780_s7 + $0x68] sm:$0xff] }
  0x1c   :  { %1908 = vmatprep.subr.mxu1 %v2201_v0  ;;  %1923 = vmatprep.subr.mxu0 %v2201_v0 }
  0x1d   :  { %1909 = vmatpush3.msra.mxu1 %v292_v11  ;;  %1924 = vmatpush3.msra.mxu0 %v384_v17  ;;  %v1709_v17 = vld [vmem:[%s2780_s7 + $0x60] sm:$0xff] }
  0x1e   :  { %1910 = vmatprep.subr.mxu1 %v2201_v0  ;;  %1925 = vmatprep.subr.mxu0 %v2201_v0 }
  0x1f   :  { %1911 = vmatpush3.msra.mxu1 %v291_v12  ;;  %1926 = vmatpush3.msra.mxu0 %v383_v18  ;;  %v1696_v12 = vld [vmem:[%s2778_s5 + $0x50] sm:$0xff]  ;;  %v1708_v18 = vld [vmem:[%s2780_s7 + $0x58] sm:$0xff] }
  0x20   :  { %1912 = vmatprep.subr.mxu1 %v2201_v0  ;;  %1927 = vmatprep.subr.mxu0 %v2201_v0 }
  0x21   :  { %1913 = vmatpush3.msra.mxu1 %v290_v13  ;;  %1928 = vmatpush3.msra.mxu0 %v382_v19  ;;  %v1694_v13 = vld [vmem:[%s2778_s5 + $0x40] sm:$0xff] }
  0x22   :  { %1914 = vmatprep.subr.mxu1 %v2201_v0  ;;  %1929 = vmatprep.subr.mxu0 %v2201_v0 }
  0x23   :  { %1915 = vmatpush3.msra.mxu1 %v289_v14  ;;  %1930 = vmatpush3.msra.mxu0 %v381_v34  ;;  %v1712_v14 = vld [vmem:[%s2780_s7 + $0x78] sm:$0xff] }
  0x24   :  { %1938 = vmatprep.subr.mxu1 %v2201_v0  ;;  %1931 = vmatprep.subr.mxu0 %v2201_v0 }
  0x25   :  { %1932 = vmatpush3.msra.mxu0 %v380_v35  ;;  %v1716_v35 = vld [vmem:[%s2775_s2 + $0x10] sm:$0xff] }
  0x26   :  { %1933 = vmatprep.subr.mxu0 %v2201_v0 }
  0x27   :  { %1934 = vmatpush3.msra.mxu0 %v379_v36  ;;  %v1714_v36 = vld [vmem:[%s2781_s8 + $0x1] ss:$0 sm:$0xff] }
  0x28   :  { %1943 = vmatprep.subr.mxu0 %v2201_v0 }
  0xd2   :  { %v139_v25 = vpop.f32.mrf.mxu0 }
  0xd3   :  { %v2363_v28 = vadd.f32 %v139_v25, %v57_v24 }
  0xd4   :  { %v2359_v26 = vpop.f32.mrf.mxu0  ;;  %v2361_v27 = vpop.f32.mrf.mxu1 }
  0xd5   :  { %v2417_v5 = vadd.f32 %v2359_v26, %v61_v2  ;;  %v1707_v26 = vld [vmem:[%s2780_s7 + $0x50] sm:$0xff]  ;;  %v1736_v2 = vld [vmem:[%s2780_s7 + $0xb8] sm:$0xff] }
  0xd6   :  { %v284_v29 = vpop.f32.mrf.mxu0  ;;  %v1894_v30 = vpop.f32.mrf.mxu1 }
  0xd7   :  { %v285_v31 = vadd.f32 %v284_v29, %v2363_v28  ;;  %v1705_v29 = vld [vmem:[%s2780_s7 + $0x40] sm:$0xff] }
  0xd8   :  { %v1899_v32 = vpop.f32.mrf.mxu0  ;;  %v1703_v30 = vld [vmem:[%s2779_s6 + $0x1] ss:$0 sm:$0xff] }
  0xd9   :  { %v288_v33 = vmax.f32 %v285_v31, 0.0 }
  0xdb   :  { %1917 = vmatmul.mubr.msk.f32.vlgmr.msra.gmra.mxu1 %vm304_vm2, %v288_v33 }
  0xdc   :  { %1940 = vmatprep.mubr.msk.f32.mxu1 %vm2202_vm0, %v2201_v0  ;;  %1939 = vmatpush3.msra.mxu1 %v1692_v42 }
  0xdd   :  { %1962 = vmatprep.subr.mxu1 %v2201_v0 }
 0x19b   :  { %v374_v38 = vpop.f32.mrf.mxu1 }
 0x19c   :  { %v375_v39 = vadd.f32 %v1688_v37, %v374_v38 }
 0x19d   :  { %v1918_v40 = vpop.f32.mrf.mxu1 }
 0x19e   :  { %v378_v41 = vmax.f32 %v375_v39, 0.0 }
 0x1a0   :  { %1936 = vmatmul.mubr.msk.f32.vlgmr.msra.gmra.mxu0 %vm304_vm2, %v378_v41 }
 0x1a1   :  { %1959 = vmatprep.mubr.msk.f32.mxu0 %vm2202_vm0, %v2201_v0  ;;  %1944 = vmatpush3.msra.mxu0 %v1701_v61 }
 0x1a2   :  { %1945 = vmatprep.subr.mxu0 %v2201_v0 }
 0x1a3   :  { %1946 = vmatpush3.msra.mxu0 %v1700_v62  ;;  %v1720_v62 = vld [vmem:[%s2778_s5 + $0x90] sm:$0xff] }
 0x1a4   :  { %1947 = vmatprep.subr.mxu0 %v2201_v0 }
 0x1a5   :  { %1948 = vmatpush3.msra.mxu0 %v1699_v1  ;;  %v1718_v1 = vld [vmem:[%s2778_s5 + $0x80] sm:$0xff] }
 0x1a6   :  { %1949 = vmatprep.subr.mxu0 %v2201_v0 }
 0x1a7   :  { %1950 = vmatpush3.msra.mxu0 %v1698_v3  ;;  %v1735_v3 = vld [vmem:[%s2780_s7 + $0xb0] sm:$0xff] }
 0x1a8   :  { %1951 = vmatprep.subr.mxu0 %v2201_v0 }
 0x1a9   :  { %1952 = vmatpush3.msra.mxu0 %v1697_v4  ;;  %v1734_v4 = vld [vmem:[%s2780_s7 + $0xa8] sm:$0xff] }
 0x1aa   :  { %1953 = vmatprep.subr.mxu0 %v2201_v0 }
 0x1ab   :  { %1954 = vmatpush3.msra.mxu0 %v1696_v12 }
 0x1ac   :  { %1955 = vmatprep.subr.mxu0 %v2201_v0 }
 0x260   :  { %v463_v44 = vpop.f32.mrf.mxu0 }
 0x261   :  { %v464_v45 = vadd.f32 %v1690_v43, %v463_v44 }
 0x262   :  { %v1937_v46 = vpop.f32.mrf.mxu0 }
 0x263   :  { %v468_v47 = vmin.f32 %v464_v45, 20.0  ;;  %vm467_vm4 = vcmp.gt.f32.partialorder %v464_v45, 20.0  ;;  %v483_v9 = vsub.f32 %v2293_v7, %v464_v45  ;;  %v1695_v7 = vld [vmem:[%s2778_s5 + $0x48] sm:$0xff] }
 0x264   :  { %1956 = vmatpush3.msra.mxu0 %v1695_v7  ;;  %v1731_v7 = vld [vmem:[%s2780_s7 + $0x90] sm:$0xff] }
 0x265   :  { %v469_v48 = vmul.f32 1.442695, %v468_v47  ;;  %1957 = vmatprep.subr.mxu0 %v2201_v0 }
 0x266   :  { %1958 = vmatpush3.msra.mxu0 %v1694_v13  ;;  %v1730_v13 = vld [vmem:[%s2780_s7 + $0x88] sm:$0xff] }
 0x267   :  { %2116 = vpow2.f32 %v469_v48  ;;  %1981 = vmatprep.subr.mxu0 %v2201_v0 }
 0x274   :  { %v2117_v49 = vpop.eup %2116 }
 0x275   :  { %v471_v50 = vadd.f32 1.0, %v2117_v49  ;;  %v474_v51 = vmul.f32 -0.5, %v2117_v49  ;;  %v477_v53 = vand.u32 2147483647, %v2117_v49 }
 0x277   :  { %2118 = vlog2.f32 %v471_v50  ;;  %v475_v52 = vadd.f32 1.0, %v474_v51  ;;  %vm478_vm3 = vcmp.lt.f32.partialorder %v477_v53, 0.0004427343  ;;  %v1725_v53 = vld [vmem:[%s2778_s5 + $0xb8] sm:$0xff] }
 0x279   :  { %v476_v56 = vmul.f32 %v2117_v49, %v475_v52 }
 0x284   :  { %v2119_v54 = vpop.eup %2118 }
 0x285   :  { %v473_v55 = vmul.f32 0.6931472, %v2119_v54  ;;  %v1724_v54 = vld [vmem:[%s2778_s5 + $0xb0] sm:$0xff] }
 0x287   :  { %v479_v57 = vsel %vm478_vm3, %v476_v56, %v473_v55  ;;  %v1723_v55 = vld [vmem:[%s2778_s5 + $0xa8] sm:$0xff]  ;;  %v1722_v56 = vld [vmem:[%s2778_s5 + $0xa0] sm:$0xff] }
 0x288   :  { %v480_v58 = vsel %vm467_vm4, %v464_v45, %v479_v57  ;;  %v1721_v57 = vld [vmem:[%s2778_s5 + $0x98] sm:$0xff] }
 0x289   :  { %v481_v59 = vadd.f32 1e-05, %v480_v58 }
 0x28b   :  { %2120 = vrcp.f32 %v481_v59 }
 0x28c   :  { %2122 = vlog2.f32 %v481_v59 }
 0x298   :  { %v2121_v63 = vpop.eup %2120 }
 0x299   :  { %485 = vrot.lane.b32.xlu0 %v2121_v63, %s2203_s24  ;;  %v2123_v6 = vpop.eup %2122  ;;  %v1719_v63 = vld [vmem:[%s2778_s5 + $0x88] sm:$0xff] }
 0x29a   :  { %v490_v8 = vmul.f32 0.6931472, %v2123_v6  ;;  %v1733_v6 = vld [vmem:[%s2780_s7 + $0xa0] sm:$0xff] }
 0x29d   :  { %502 = vrot.lane.b32.xlu0 %v2363_v28, %s2204_s29  ;;  %v1706_v28 = vld [vmem:[%s2780_s7 + $0x48] sm:$0xff] }
 0x2a1   :  { %1084 = vrot.lane.b32.xlu0 %v2417_v5, %s2204_s29 }
 0x2a5   :  { %492 = vrot.lane.b32.xlu0 %v490_v8, %s2203_s24  ;;  %v1732_v8 = vld [vmem:[%s2780_s7 + $0x98] sm:$0xff] }
 0x30b   :  { %v486_v10 = vpop.permute.xlu0 %485 }
 0x30c   :  { %v2424_v11 = vmul.f32 %v486_v10, %v483_v9 }
 0x30e   :  { %1941 = vmatmul.mubr.msk.f32.vlgmr.msra.gmra.mxu1 %vm69_vm1, %v2424_v11 }
 0x30f   :  { %1978 = vmatprep.mubr.msk.f32.mxu1 %vm2202_vm0, %v2201_v0  ;;  %1963 = vmatpush3.msra.mxu1 %v1712_v14  ;;  %v503_v19 = vpop.permute.xlu0 %502  ;;  %v1727_v14 = vld [vmem:[%s2779_s6 + $0x2] ss:$0 sm:$0xff] }
 0x310   :  { %1964 = vmatprep.subr.mxu1 %v2201_v0 }
 0x311   :  { %1965 = vmatpush3.msra.mxu1 %v1711_v15 }
 0x312   :  { %1966 = vmatprep.subr.mxu1 %v2201_v0 }
 0x313   :  { %1967 = vmatpush3.msra.mxu1 %v1710_v16 }
 0x314   :  { %1968 = vmatprep.subr.mxu1 %v2201_v0 }
 0x315   :  { %1969 = vmatpush3.msra.mxu1 %v1709_v17 }
 0x316   :  { %1970 = vmatprep.subr.mxu1 %v2201_v0 }
 0x317   :  { %1971 = vmatpush3.msra.mxu1 %v1708_v18 }
 0x318   :  { %1972 = vmatprep.subr.mxu1 %v2201_v0 }
 0x319   :  { %1973 = vmatpush3.msra.mxu1 %v1707_v26 }
 0x31a   :  { %1974 = vmatprep.subr.mxu1 %v2201_v0 }
 0x31b   :  { %1975 = vmatpush3.msra.mxu1 %v1706_v28 }
 0x31c   :  { %1976 = vmatprep.subr.mxu1 %v2201_v0 }
 0x31d   :  { %1977 = vmatpush3.msra.mxu1 %v1705_v29 }
 0x31e   :  { %1986 = vmatprep.subr.mxu1 %v2201_v0 }
 0x3ce   :  { %v574_v20 = vpop.f32.mrf.mxu1 }
 0x3cf   :  { %v575_v22 = vadd.f32 %v574_v20, %v503_v19  ;;  %v1740_v19 = vld [vmem:[%s2775_s2 + $0x18] sm:$0xff]  ;;  %v1738_v20 = vld [vmem:[%s2781_s8 + $0x2] ss:$0 sm:$0xff] }
 0x3d0   :  { %v1942_v24 = vpop.f32.mrf.mxu1 }
 0x3d1   :  { %v578_v25 = vmax.f32 %v575_v22, 0.0 }
 0x3d3   :  { %1960 = vmatmul.mubr.msk.f32.vlgmr.msra.gmra.mxu0 %vm304_vm2, %v578_v25 }
 0x3d4   :  { %1983 = vmatprep.mubr.msk.f32.mxu0 %vm2202_vm0, %v2201_v0  ;;  %1982 = vmatpush3.msra.mxu0 %v1716_v35 }
 0x3d5   :  { %2005 = vmatprep.subr.mxu0 %v2201_v0 }
 0x493   :  { %v665_v31 = vpop.f32.mrf.mxu0 }
 0x494   :  { %v666_v32 = vadd.f32 %v1703_v30, %v665_v31 }
 0x495   :  { %v1961_v33 = vpop.f32.mrf.mxu0 }
 0x496   :  { %v669_v34 = vmax.f32 %v666_v32, 0.0 }
 0x498   :  { %1979 = vmatmul.mubr.msk.f32.vlgmr.msra.gmra.mxu1 %vm304_vm2, %v669_v34 }
 0x499   :  { %2002 = vmatprep.mubr.msk.f32.mxu1 %vm2202_vm0, %v2201_v0  ;;  %1987 = vmatpush3.msra.mxu1 %v1725_v53  ;;  %v1743_v53 = vld [vmem:[%s2778_s5 + $0xc8] sm:$0xff] }
 0x49a   :  { %1988 = vmatprep.subr.mxu1 %v2201_v0 }
 0x49b   :  { %1989 = vmatpush3.msra.mxu1 %v1724_v54  ;;  %v1742_v54 = vld [vmem:[%s2778_s5 + $0xc0] sm:$0xff] }
 0x49c   :  { %1990 = vmatprep.subr.mxu1 %v2201_v0 }
 0x49d   :  { %1991 = vmatpush3.msra.mxu1 %v1723_v55  ;;  %v1760_v55 = vld [vmem:[%s2780_s7 + $0xf8] sm:$0xff] }
 0x49e   :  { %1992 = vmatprep.subr.mxu1 %v2201_v0 }
 0x49f   :  { %1993 = vmatpush3.msra.mxu1 %v1722_v56  ;;  %v1759_v56 = vld [vmem:[%s2780_s7 + $0xf0] sm:$0xff] }
 0x4a0   :  { %1994 = vmatprep.subr.mxu1 %v2201_v0 }
 0x4a1   :  { %1995 = vmatpush3.msra.mxu1 %v1721_v57  ;;  %v1758_v57 = vld [vmem:[%s2780_s7 + $0xe8] sm:$0xff] }
 0x4a2   :  { %1996 = vmatprep.subr.mxu1 %v2201_v0 }
 0x4a3   :  { %1997 = vmatpush3.msra.mxu1 %v1720_v62 }
 0x4a4   :  { %1998 = vmatprep.subr.mxu1 %v2201_v0 }
 0x4a5   :  { %1999 = vmatpush3.msra.mxu1 %v1719_v63 }
 0x4a6   :  { %2000 = vmatprep.subr.mxu1 %v2201_v0 }
 0x4a7   :  { %2001 = vmatpush3.msra.mxu1 %v1718_v1 }
 0x4a8   :  { %2024 = vmatprep.subr.mxu1 %v2201_v0 }
 0x558   :  { %v756_v37 = vpop.f32.mrf.mxu1 }
 0x559   :  { %v757_v38 = vadd.f32 %v1714_v36, %v756_v37 }
 0x55a   :  { %v1980_v39 = vpop.f32.mrf.mxu1 }
 0x55b   :  { %v761_v40 = vmin.f32 %v757_v38, 20.0  ;;  %vm760_vm6 = vcmp.gt.f32.partialorder %v757_v38, 20.0  ;;  %v776_v59 = vsub.f32 %v2424_v11, %v757_v38 }
 0x55d   :  { %v762_v41 = vmul.f32 1.442695, %v761_v40  ;;  %v1749_v40 = vld [vmem:[%s2778_s5 + $0xf8] sm:$0xff] }
 0x55f   :  { %2124 = vpow2.f32 %v762_v41  ;;  %v1748_v41 = vld [vmem:[%s2778_s5 + $0xf0] sm:$0xff] }
 0x56c   :  { %v2125_v42 = vpop.eup %2124 }
 0x56d   :  { %v764_v43 = vadd.f32 1.0, %v2125_v42  ;;  %v767_v44 = vmul.f32 -0.5, %v2125_v42  ;;  %v770_v46 = vand.u32 2147483647, %v2125_v42 }
 0x56f   :  { %2126 = vlog2.f32 %v764_v43  ;;  %v768_v45 = vadd.f32 1.0, %v767_v44  ;;  %vm771_vm5 = vcmp.lt.f32.partialorder %v770_v46, 0.0004427343  ;;  %v1746_v43 = vld [vmem:[%s2778_s5 + $0xe0] sm:$0xff]  ;;  %v1745_v44 = vld [vmem:[%s2778_s5 + $0xd8] sm:$0xff] }
 0x571   :  { %v769_v49 = vmul.f32 %v2125_v42, %v768_v45  ;;  %v1747_v42 = vld [vmem:[%s2778_s5 + $0xe8] sm:$0xff] }
 0x57c   :  { %v2127_v47 = vpop.eup %2126 }
 0x57d   :  { %v766_v48 = vmul.f32 0.6931472, %v2127_v47 }
 0x57f   :  { %v772_v50 = vsel %vm771_vm5, %v769_v49, %v766_v48 }
 0x580   :  { %v773_v51 = vsel %vm760_vm6, %v757_v38, %v772_v50 }
 0x581   :  { %v2490_v52 = vadd.f32 1e-05, %v773_v51  ;;  %v1744_v51 = vld [vmem:[%s2778_s5 + $0xd0] sm:$0xff] }
 0x583   :  { %2128 = vrcp.f32 %v2490_v52 }
 0x590   :  { %v2129_v58 = vpop.eup %2128 }
 0x591   :  { %778 = vrot.lane.b32.xlu1 %v2129_v58, %s2203_s24  ;;  %v1757_v58 = vld [vmem:[%s2780_s7 + $0xe0] sm:$0xff] }
 0x603   :  { %v779_v60 = vpop.permute.xlu1 %778 }
 0x604   :  { %v2515_v61 = vmul.f32 %v779_v60, %v776_v59  ;;  %v1756_v59 = vld [vmem:[%s2780_s7 + $0xd8] sm:$0xff]  ;;  %v1085_v60 = vpop.permute.xlu0 %1084 }
 0x606   :  { %1984 = vmatmul.mubr.msk.f32.vlgmr.msra.gmra.mxu0 %vm69_vm1, %v2515_v61 }
 0x607   :  { %2021 = vmatprep.mubr.msk.f32.mxu0 %vm2202_vm0, %v2201_v0  ;;  %2006 = vmatpush3.msra.mxu0 %v1736_v2  ;;  %v1755_v2 = vld [vmem:[%s2780_s7 + $0xd0] sm:$0xff] }
 0x608   :  { %2007 = vmatprep.subr.mxu0 %v2201_v0 }
 0x609   :  { %2008 = vmatpush3.msra.mxu0 %v1735_v3  ;;  %v1754_v3 = vld [vmem:[%s2780_s7 + $0xc8] sm:$0xff] }
 0x60a   :  { %2009 = vmatprep.subr.mxu0 %v2201_v0 }
 0x60b   :  { %2010 = vmatpush3.msra.mxu0 %v1734_v4  ;;  %v1753_v4 = vld [vmem:[%s2780_s7 + $0xc0] sm:$0xff] }
 0x60c   :  { %2011 = vmatprep.subr.mxu0 %v2201_v0 }
 0x60d   :  { %2012 = vmatpush3.msra.mxu0 %v1733_v6  ;;  %v1751_v6 = vld [vmem:[%s2779_s6 + $0x3] ss:$0 sm:$0xff] }
 0x60e   :  { %2013 = vmatprep.subr.mxu0 %v2201_v0 }
 0x60f   :  { %2014 = vmatpush3.msra.mxu0 %v1732_v8 }
 0x610   :  { %2015 = vmatprep.subr.mxu0 %v2201_v0 }
 0x611   :  { %2016 = vmatpush3.msra.mxu0 %v1731_v7  ;;  %v1762_v7 = vld [vmem:[%s2781_s8 + $0x3] ss:$0 sm:$0xff] }
 0x612   :  { %2017 = vmatprep.subr.mxu0 %v2201_v0 }
 0x613   :  { %2018 = vmatpush3.msra.mxu0 %v1730_v13 }
 0x614   :  { %2019 = vmatprep.subr.mxu0 %v2201_v0 }
 0x6c6   :  { %v863_v9 = vpop.f32.mrf.mxu0 }
 0x6c7   :  { %v864_v10 = vadd.f32 %v863_v9, %v2417_v5  ;;  %v1729_v5 = vld [vmem:[%s2780_s7 + $0x80] sm:$0xff] }
 0x6c8   :  { %v1985_v11 = vpop.f32.mrf.mxu0  ;;  %2020 = vmatpush3.msra.mxu0 %v1729_v5 }
 0x6c9   :  { %v867_v12 = vmax.f32 %v864_v10, 0.0  ;;  %2029 = vmatprep.subr.mxu0 %v2201_v0 }
 0x6cb   :  { %2003 = vmatmul.mubr.msk.f32.vlgmr.msra.gmra.mxu1 %vm304_vm2, %v867_v12  ;;  %v1764_v12 = vld [vmem:[%s2775_s2 + $0x20] sm:$0xff] }
 0x6cc   :  { %2026 = vmatprep.mubr.msk.f32.mxu1 %vm2202_vm0, %v2201_v0  ;;  %2025 = vmatpush3.msra.mxu1 %v1740_v19 }
 0x6cd   :  { %2048 = vmatprep.subr.mxu1 %v2201_v0 }
 0x78b   :  { %v954_v15 = vpop.f32.mrf.mxu1 }
 0x78c   :  { %v955_v16 = vadd.f32 %v1727_v14, %v954_v15 }
 0x78d   :  { %v2004_v17 = vpop.f32.mrf.mxu1 }
 0x78e   :  { %v958_v18 = vmax.f32 %v955_v16, 0.0 }
 0x790   :  { %2022 = vmatmul.mubr.msk.f32.vlgmr.msra.gmra.mxu0 %vm304_vm2, %v958_v18 }
 0x791   :  { %2045 = vmatprep.mubr.msk.f32.mxu0 %vm2202_vm0, %v2201_v0  ;;  %2030 = vmatpush3.msra.mxu0 %v1749_v40 }
 0x792   :  { %2031 = vmatprep.subr.mxu0 %v2201_v0 }
 0x793   :  { %2032 = vmatpush3.msra.mxu0 %v1748_v41 }
 0x794   :  { %2033 = vmatprep.subr.mxu0 %v2201_v0 }
 0x795   :  { %2034 = vmatpush3.msra.mxu0 %v1747_v42 }
 0x796   :  { %2035 = vmatprep.subr.mxu0 %v2201_v0 }
 0x797   :  { %2036 = vmatpush3.msra.mxu0 %v1746_v43  ;;  %v1773_v43 = vld [vmem:[%s2778_s5 + $0x138] sm:$0xff] }
 0x798   :  { %2037 = vmatprep.subr.mxu0 %v2201_v0 }
 0x799   :  { %2038 = vmatpush3.msra.mxu0 %v1745_v44  ;;  %v1772_v44 = vld [vmem:[%s2778_s5 + $0x130] sm:$0xff] }
 0x79a   :  { %2039 = vmatprep.subr.mxu0 %v2201_v0 }
 0x79b   :  { %2040 = vmatpush3.msra.mxu0 %v1744_v51  ;;  %v1784_v51 = vld [vmem:[%s2780_s7 + $0x138] sm:$0xff] }
 0x79c   :  { %2041 = vmatprep.subr.mxu0 %v2201_v0 }
 0x79d   :  { %2042 = vmatpush3.msra.mxu0 %v1743_v53  ;;  %v1783_v53 = vld [vmem:[%s2780_s7 + $0x130] sm:$0xff] }
 0x79e   :  { %2043 = vmatprep.subr.mxu0 %v2201_v0 }
 0x79f   :  { %2044 = vmatpush3.msra.mxu0 %v1742_v54  ;;  %v1782_v54 = vld [vmem:[%s2780_s7 + $0x128] sm:$0xff] }
 0x7a0   :  { %2067 = vmatprep.subr.mxu0 %v2201_v0 }
 0x850   :  { %v1045_v22 = vpop.f32.mrf.mxu0 }
 0x851   :  { %v1046_v24 = vadd.f32 %v1738_v20, %v1045_v22 }
 0x852   :  { %v2023_v25 = vpop.f32.mrf.mxu0 }
 0x853   :  { %v1050_v26 = vmin.f32 %v1046_v24, 20.0  ;;  %vm1049_vm8 = vcmp.gt.f32.partialorder %v1046_v24, 20.0  ;;  %v1065_v48 = vsub.f32 %v2515_v61, %v1046_v24 }
 0x855   :  { %v1051_v28 = vmul.f32 1.442695, %v1050_v26 }
 0x857   :  { %2130 = vpow2.f32 %v1051_v28 }
 0x864   :  { %v2131_v29 = vpop.eup %2130 }
 0x865   :  { %v1053_v30 = vadd.f32 1.0, %v2131_v29  ;;  %v1056_v31 = vmul.f32 -0.5, %v2131_v29  ;;  %v1059_v33 = vand.u32 2147483647, %v2131_v29 }
 0x867   :  { %2132 = vlog2.f32 %v1053_v30  ;;  %v1057_v32 = vadd.f32 1.0, %v1056_v31  ;;  %vm1060_vm7 = vcmp.lt.f32.partialorder %v1059_v33, 0.0004427343 }
 0x869   :  { %v1058_v36 = vmul.f32 %v2131_v29, %v1057_v32 }
 0x874   :  { %v2133_v34 = vpop.eup %2132 }
 0x875   :  { %v1055_v35 = vmul.f32 0.6931472, %v2133_v34 }
 0x877   :  { %v1061_v37 = vsel %vm1060_vm7, %v1058_v36, %v1055_v35  ;;  %v493_v36 = vpop.permute.xlu0 %492 }
 0x878   :  { %v1062_v38 = vsel %vm1049_vm8, %v1046_v24, %v1061_v37  ;;  %v495_v37 = vsel %vm69_vm1, %v493_v36, 0.0 }
 0x879   :  { %v1063_v39 = vadd.f32 1e-05, %v1062_v38 }
 0x87b   :  { %2134 = vrcp.f32 %v1063_v39 }
 0x87c   :  { %2136 = vlog2.f32 %v1063_v39 }
 0x888   :  { %v2135_v45 = vpop.eup %2134 }
 0x889   :  { %v2137_v46 = vpop.eup %2136  ;;  %1067 = vrot.lane.b32.xlu1 %v2135_v45, %s2203_s24  ;;  %v1771_v45 = vld [vmem:[%s2778_s5 + $0x128] sm:$0xff] }
 0x88a   :  { %v1072_v47 = vmul.f32 0.6931472, %v2137_v46  ;;  %v1770_v46 = vld [vmem:[%s2778_s5 + $0x120] sm:$0xff] }
 0x88c   :  { %1074 = vrot.lane.b32.xlu0 %v1072_v47, %s2203_s24  ;;  %v1769_v47 = vld [vmem:[%s2778_s5 + $0x118] sm:$0xff] }
 0x8fb   :  { %v1068_v49 = vpop.permute.xlu1 %1067 }
 0x8fc   :  { %v2605_v50 = vmul.f32 %v1068_v49, %v1065_v48  ;;  %v1768_v48 = vld [vmem:[%s2778_s5 + $0x110] sm:$0xff]  ;;  %v1767_v49 = vld [vmem:[%s2778_s5 + $0x108] sm:$0xff] }
 0x8fe   :  { %2027 = vmatmul.mubr.msk.f32.vlgmr.msra.gmra.mxu1 %vm69_vm1, %v2605_v50 }
 0x8ff   :  { %2064 = vmatprep.mubr.msk.f32.mxu1 %vm2202_vm0, %v2201_v0  ;;  %2049 = vmatpush3.msra.mxu1 %v1760_v55  ;;  %v1781_v55 = vld [vmem:[%s2780_s7 + $0x120] sm:$0xff] }
 0x900   :  { %2050 = vmatprep.subr.mxu1 %v2201_v0 }
 0x901   :  { %2051 = vmatpush3.msra.mxu1 %v1759_v56  ;;  %v1780_v56 = vld [vmem:[%s2780_s7 + $0x118] sm:$0xff] }
 0x902   :  { %2052 = vmatprep.subr.mxu1 %v2201_v0 }
 0x903   :  { %2053 = vmatpush3.msra.mxu1 %v1758_v57  ;;  %v64_v57 = vsub.s32 2, %v2353_v21  ;;  %v1778_v21 = vld [vmem:[%s2780_s7 + $0x108] sm:$0xff] }
 0x904   :  { %2054 = vmatprep.subr.mxu1 %v2201_v0 }
 0x905   :  { %2055 = vmatpush3.msra.mxu1 %v1757_v58  ;;  %v65_v58 = vrot.slane %v2356_v23, %v64_v57  ;;  %v1777_v23 = vld [vmem:[%s2780_s7 + $0x100] sm:$0xff] }
 0x906   :  { %2056 = vmatprep.subr.mxu1 %v2201_v0 }
 0x907   :  { %2057 = vmatpush3.msra.mxu1 %v1756_v59  ;;  %v211_v59 = vadd.f32 %v2361_v27, %v65_v58  ;;  %v1775_v27 = vld [vmem:[%s2779_s6 + $0x4] ss:$0 sm:$0xff]  ;;  %s2205_s6 = smov [#allocation5]  }
 0x908   :  { %2058 = vmatprep.subr.mxu1 %v2201_v0 }
 0x909   :  { %2059 = vmatpush3.msra.mxu1 %v1755_v2 }
 0x90a   :  { %2060 = vmatprep.subr.mxu1 %v2201_v0 }
 0x90b   :  { %2061 = vmatpush3.msra.mxu1 %v1754_v3 }
 0x90c   :  { %2062 = vmatprep.subr.mxu1 %v2201_v0 }
 0x90d   :  { %2063 = vmatpush3.msra.mxu1 %v1753_v4 }
 0x90e   :  { %2072 = vmatprep.subr.mxu1 %v2201_v0 }
 0x9be   :  { %v1156_v61 = vpop.f32.mrf.mxu1 }
 0x9bf   :  { %v1157_v62 = vadd.f32 %v1156_v61, %v1085_v60 }
 0x9c0   :  { %v2028_v63 = vpop.f32.mrf.mxu1 }
 0x9c1   :  { %v1160_v1 = vmax.f32 %v1157_v62, 0.0 }
 0x9c3   :  { %2046 = vmatmul.mubr.msk.f32.vlgmr.msra.gmra.mxu0 %vm304_vm2, %v1160_v1  ;;  %v1779_v1 = vld [vmem:[%s2780_s7 + $0x110] sm:$0xff]  ;;  %s1672_s7 = sshll.u32 %s2205_s6, 4  ;;  %s1673_s7 = int_to_ptr.vmem [resolvable:$true] %s1672_s7 }
 0x9c4   :  { %2069 = vmatprep.mubr.msk.f32.mxu0 %vm2202_vm0, %v2201_v0  ;;  %2068 = vmatpush3.msra.mxu0 %v1764_v12  ;;  %p2181_p6 = scmp.lt.s32.totalorder %s1673_s7, %s1673_s7 }
 0x9c5   :  { %2091 = vmatprep.subr.mxu0 %v2201_v0 }
 0xa83   :  { %v1247_v8 = vpop.f32.mrf.mxu0 }
 0xa84   :  { %v1248_v9 = vadd.f32 %v1751_v6, %v1247_v8  ;;  %v1786_v8 = vld [vmem:[%s2781_s8 + $0x4] ss:$0 sm:$0xff]  ;;  %s2176_s8 = scalar_lea.vmem %s1673_s7, 128 }
 0xa85   :  { %v2047_v10 = vpop.f32.mrf.mxu0  ;;  %p2177_p5 = scmp.ne.s32.totalorder %s1673_s7, %s2176_s8  ;;  %p2182_p7 = scmp.lt.s32.totalorder %s2176_s8, %s2176_s8 }
 0xa86   :  { %v1251_v11 = vmax.f32 %v1248_v9, 0.0 }
 0xa87   :  { %p2183_p8 = por %p2182_p7, %p2181_p6 }
 0xa88   :  { %2065 = vmatmul.mubr.msk.f32.vlgmr.msra.gmra.mxu1 %vm304_vm2, %v1251_v11 }
 0xa89   :  { %2088 = vmatprep.mubr.msk.f32.mxu1 %vm2202_vm0, %v2201_v0  ;;  %2073 = vmatpush3.msra.mxu1 %v1773_v43  ;;  %p2184_p9 = pnand %p2183_p8, %p2177_p5 }
 0xa8a   :  { %2074 = vmatprep.subr.mxu1 %v2201_v0 }
 0xa8b   :  { %2075 = vmatpush3.msra.mxu1 %v1772_v44 }
 0xa8c   :  { %2076 = vmatprep.subr.mxu1 %v2201_v0 }
 0xa8d   :  { %2077 = vmatpush3.msra.mxu1 %v1771_v45 }
 0xa8e   :  { %2078 = vmatprep.subr.mxu1 %v2201_v0 }
 0xa8f   :  { %2079 = vmatpush3.msra.mxu1 %v1770_v46 }
 0xa90   :  { %2080 = vmatprep.subr.mxu1 %v2201_v0 }
 0xa91   :  { %2081 = vmatpush3.msra.mxu1 %v1769_v47 }
 0xa92   :  { %2082 = vmatprep.subr.mxu1 %v2201_v0 }
 0xa93   :  { %2083 = vmatpush3.msra.mxu1 %v1768_v48 }
 0xa94   :  { %2084 = vmatprep.subr.mxu1 %v2201_v0 }
 0xa95   :  { %2085 = vmatpush3.msra.mxu1 %v1767_v49 }
 0xa96   :  { %2086 = vmatprep.subr.mxu1 %v2201_v0 }
 0xb48   :  { %v1338_v13 = vpop.f32.mrf.mxu1 }
 0xb49   :  { %v1339_v5 = vadd.f32 %v1762_v7, %v1338_v13 }
 0xb4a   :  { %v2066_v14 = vpop.f32.mrf.mxu1 }
 0xb4b   :  { %v1343_v15 = vmin.f32 %v1339_v5, 20.0  ;;  %vm1342_vm10 = vcmp.gt.f32.partialorder %v1339_v5, 20.0  ;;  %v1358_v38 = vsub.f32 %v2605_v50, %v1339_v5  ;;  %v1766_v50 = vld [vmem:[%s2778_s5 + $0x100] sm:$0xff] }
 0xb4c   :  { %2087 = vmatpush3.msra.mxu1 %v1766_v50 }
 0xb4d   :  { %v1344_v16 = vmul.f32 1.442695, %v1343_v15 }
 0xb4f   :  { %2138 = vpow2.f32 %v1344_v16 }
 0xb5c   :  { %v2139_v17 = vpop.eup %2138 }
 0xb5d   :  { %v1346_v18 = vadd.f32 1.0, %v2139_v17  ;;  %v1349_v19 = vmul.f32 -0.5, %v2139_v17  ;;  %v1352_v22 = vand.u32 2147483647, %v2139_v17 }
 0xb5f   :  { %2140 = vlog2.f32 %v1346_v18  ;;  %v1350_v20 = vadd.f32 1.0, %v1349_v19  ;;  %vm1353_vm9 = vcmp.lt.f32.partialorder %v1352_v22, 0.0004427343 }
 0xb60   :  { %2142 = vlog2.f32 %v2490_v52 }
 0xb61   :  { %v1351_v26 = vmul.f32 %v2139_v17, %v1350_v20 }
 0xb6c   :  { %v2141_v24 = vpop.eup %2140 }
 0xb6d   :  { %v1348_v25 = vmul.f32 0.6931472, %v2141_v24  ;;  %v2143_v31 = vpop.eup %2142 }
 0xb6e   :  { %v783_v33 = vmul.f32 0.6931472, %v2143_v31 }
 0xb6f   :  { %v1354_v28 = vsel %vm1353_vm9, %v1351_v26, %v1348_v25 }
 0xb70   :  { %v1355_v29 = vsel %vm1342_vm10, %v1339_v5, %v1354_v28  ;;  %v1075_v28 = vpop.permute.xlu0 %1074 }
 0xb71   :  { %v1356_v30 = vadd.f32 1e-05, %v1355_v29  ;;  %v1077_v29 = vsel %vm69_vm1, %v1075_v28, 0.0 }
 0xb73   :  { %2144 = vrcp.f32 %v1356_v30 }
 0xb74   :  { %2146 = vlog2.f32 %v1356_v30 }
 0xb80   :  { %v2145_v32 = vpop.eup %2144 }
 0xb81   :  { %1360 = vrot.lane.b32.xlu1 %v2145_v32, %s2203_s24  ;;  %v2147_v34 = vpop.eup %2146 }
 0xb82   :  { %v1365_v35 = vmul.f32 0.6931472, %v2147_v34 }
 0xb85   :  { %785 = vrot.lane.b32.xlu1 %v783_v33, %s2203_s24 }
 0xb89   :  { %1367 = vrot.lane.b32.xlu1 %v1365_v35, %s2203_s24 }
 0xbad   :  { %496 = vadd.xlane.f32.xlu1 %v495_v37 }
 0xbf3   :  { %v1361_v52 = vpop.permute.xlu1 %1360 }
 0xbf4   :  { %v2677_v39 = vmul.f32 %v1361_v52, %v1358_v38 }
 0xbf6   :  { %2070 = vmatmul.mubr.msk.f32.vlgmr.msra.gmra.mxu0 %vm69_vm1, %v2677_v39 }
 0xbf7   :  { %v2681_v40 = vpop.permute.xlu1 %785  ;;  %2107 = vmatprep.mubr.msk.f32.mxu0 %vm2202_vm0, %v2201_v0  ;;  %2092 = vmatpush3.msra.mxu0 %v1784_v51 }
 0xbf8   :  { %2093 = vmatprep.subr.mxu0 %v2201_v0  ;;  %v788_v26 = vsel %vm69_vm1, %v2681_v40, 0.0 }
 0xbf9   :  { %2094 = vmatpush3.msra.mxu0 %v1783_v53 }
 0xbfa   :  { %2095 = vmatprep.subr.mxu0 %v2201_v0 }
 0xbfb   :  { %v1368_v41 = vpop.permute.xlu1 %1367  ;;  %2096 = vmatpush3.msra.mxu0 %v1782_v54 }
 0xbfc   :  { %v1370_v42 = vsel %vm69_vm1, %v1368_v41, 0.0  ;;  %2097 = vmatprep.subr.mxu0 %v2201_v0 }
 0xbfd   :  { %1371 = vadd.xlane.f32.xlu1 %v1370_v42  ;;  %2098 = vmatpush3.msra.mxu0 %v1781_v55 }
 0xbfe   :  { %2099 = vmatprep.subr.mxu0 %v2201_v0 }
 0xbff   :  { %2100 = vmatpush3.msra.mxu0 %v1780_v56 }
 0xc00   :  { %2101 = vmatprep.subr.mxu0 %v2201_v0 }
 0xc01   :  { %2102 = vmatpush3.msra.mxu0 %v1779_v1 }
 0xc02   :  { %2103 = vmatprep.subr.mxu0 %v2201_v0 }
 0xc03   :  { %2104 = vmatpush3.msra.mxu0 %v1778_v21 }
 0xc04   :  { %2105 = vmatprep.subr.mxu0 %v2201_v0 }
 0xc05   :  { %2106 = vmatpush3.msra.mxu0 %v1777_v23 }
 0xc36   :  { %v497_v33 = vpop.xlane.xlu1 %496 }
 0xc37   :  { %v498_v35 = vsub.f32 0.0, %v497_v33 }
 0xcb6   :  { %v1445_v60 = vpop.f32.mrf.mxu0 }
 0xcb7   :  { %v1446_v61 = vadd.f32 %v1445_v60, %v211_v59 }
 0xcb8   :  { %v2071_v62 = vpop.f32.mrf.mxu0 }
 0xcb9   :  { %v1449_v63 = vmax.f32 %v1446_v61, 0.0 }
 0xcbb   :  { %2089 = vmatmul.mubr.msk.f32.vlgmr.msra.gmra.mxu1 %vm304_vm2, %v1449_v63 }
 0xd7b   :  { %v1536_v2 = vpop.f32.mrf.mxu1 }
 0xd7c   :  { %v1537_v3 = vadd.f32 %v1775_v27, %v1536_v2 }
 0xd7d   :  { %v2090_v4 = vpop.f32.mrf.mxu1 }
 0xd7e   :  { %v1540_v6 = vmax.f32 %v1537_v3, 0.0 }
 0xd80   :  { %2108 = vmatmul.mubr.msk.f32.vlgmr.msra.gmra.mxu0 %vm304_vm2, %v1540_v6 }
 0xe40   :  { %v1627_v9 = vpop.f32.mrf.mxu0 }
 0xe41   :  { %v1628_v10 = vadd.f32 %v1786_v8, %v1627_v9 }
 0xe42   :  { %v2109_v11 = vpop.f32.mrf.mxu0 }
 0xe43   :  { %v1632_v12 = vmin.f32 %v1628_v10, 20.0  ;;  %vm1631_vm12 = vcmp.gt.f32.partialorder %v1628_v10, 20.0  ;;  %v1647_v52 = vsub.f32 %v2677_v39, %v1628_v10 }
 0xe45   :  { %v1633_v0 = vmul.f32 1.442695, %v1632_v12 }
 0xe47   :  { %2148 = vpow2.f32 %v1633_v0 }
 0xe54   :  { %v2149_v7 = vpop.eup %2148 }
 0xe55   :  { %v1635_v13 = vadd.f32 1.0, %v2149_v7  ;;  %v1638_v5 = vmul.f32 -0.5, %v2149_v7  ;;  %v1641_v15 = vand.u32 2147483647, %v2149_v7 }
 0xe57   :  { %2150 = vlog2.f32 %v1635_v13  ;;  %v1639_v14 = vadd.f32 1.0, %v1638_v5  ;;  %vm1642_vm11 = vcmp.lt.f32.partialorder %v1641_v15, 0.0004427343 }
 0xe59   :  { %v1640_v18 = vmul.f32 %v2149_v7, %v1639_v14 }
 0xe64   :  { %v2151_v16 = vpop.eup %2150 }
 0xe65   :  { %v1637_v17 = vmul.f32 0.6931472, %v2151_v16 }
 0xe67   :  { %v1643_v19 = vsel %vm1642_vm11, %v1640_v18, %v1637_v17 }
 0xe68   :  { %v1644_v20 = vsel %vm1631_vm12, %v1628_v10, %v1643_v19 }
 0xe69   :  { %v1645_v22 = vadd.f32 1e-05, %v1644_v20 }
 0xe6b   :  { %2152 = vlog2.f32 %v1645_v22 }
 0xe6c   :  { %2154 = vrcp.f32 %v1645_v22 }
 0xe78   :  { %v2153_v24 = vpop.eup %2152 }
 0xe79   :  { %v1654_v25 = vmul.f32 0.6931472, %v2153_v24  ;;  %v2155_v30 = vpop.eup %2154 }
 0xe7b   :  { %1656 = vrot.lane.b32.xlu0 %v1654_v25, %s2203_s24 }
 0xe9a   :  { %789 = vadd.xlane.f32.xlu0 %v788_v26 }
 0xe9e   :  { %1078 = vadd.xlane.f32.xlu0 %v1077_v29 }
 0xeb4   :  { %1649 = vrot.lane.b32.xlu0 %v2155_v30, %s2203_s24 }
 0xeed   :  { %v1657_v31 = vpop.permute.xlu0 %1656 }
 0xeee   :  { %v1659_v32 = vsel %vm69_vm1, %v1657_v31, 0.0 }
 0xeef   :  { %1660 = vadd.xlane.f32.xlu1 %v1659_v32 }
 0xf23   :  { %v790_v34 = vpop.xlane.xlu0 %789 }
 0xf24   :  { %v791_v36 = vsub.f32 %v498_v35, %v790_v34 }
 0xf27   :  { %v1079_v37 = vpop.xlane.xlu0 %1078 }
 0xf28   :  { %v1080_v38 = vsub.f32 %v791_v36, %v1079_v37 }
 0xf2b   :  { %v1650_v40 = vpop.permute.xlu0 %1649 }
 0xf2c   :  { %v1652_v41 = vmul.f32 %v1650_v40, %v1647_v52 }
 0xf2e   :  { %1663 = vst.msk [vmem:[#allocation5] sm:$0xff] %vm69_vm1, %v1652_v41 }
 0xf2f   :  { %2187 = shalt.err (!%p2184_p9)
}
 0xf30   :  { %1675 = dma.vmem_to_hbm [thread:$0]  %s1673_s7, 128, %s2782_s9, [#allocation4]   ;;  %v1372_v42 = vpop.xlane.xlu1 %1371  ;;  %vm1664_vm13 = vcmask 7168  }
 0xf31   :  { %v1373_v43 = vsub.f32 %v1080_v38, %v1372_v42 }
 0xf78   :  { %v1661_v39 = vpop.xlane.xlu1 %1660 }
 0xf79   :  { %v1662_v44 = vsub.f32 %v1373_v43, %v1661_v39 }
 0xf7b   :  { %1665 = vst.msk [vmem:[%s2783_s10] sm:$0xff] %vm1664_vm13, %v1662_v44 }
 0xf7c   :  { %2198 = dma.done.wait [#allocation4], 128  }
 0xf7d   :  { %2199 = vsyncadd [#allocation4], 4294967168 }
 0xf7e   :  { %1683 = vsyncpa [#allocation3], 1 }
 0xf7f   :  { %1684 = vsyncpa [#allocation4], 1 }

</bundles_post_ra>
